<compile_context>
chip_gen: v7x
topology: tpu7x:2x2x1
jax: 0.10.0
libtpu: 0.0.40
codegen_flags: <defaults>
</compile_context>

<pallas_src>
import functools

import jax
import jax.numpy as jnp
from jax import lax
from jax.experimental import pallas as pl
from jax.experimental.pallas import tpu as pltpu


BN_EPS = 1e-5


def _resgraphd_kernel(x_ref, w_ref, gb_ref, wf_ref, bf_ref, o_ref, *, n_valid):
    """All operands VMEM-resident, transposed (features, batch) layout.

    x_ref  : (nh, Npad)       activations, batch on lanes (zero-padded columns)
    w_ref  : (9, nh, nh)      hidden Linear weights, PyTorch (out, in) layout
    gb_ref : (9, nh, 2)       BatchNorm gamma ([..., 0]) and beta ([..., 1])
    wf_ref : (nd_out, nh)     final Linear weight (out, in)
    bf_ref : (nd_out, 1)      final Linear bias (column)
    o_ref  : (nd_out, Npad)   output, batch on lanes
    """
    nh, npad = x_ref.shape
    inv_n = 1.0 / float(n_valid)

    # Lane mask for the zero-padded batch columns (hoisted out of the layer loop).
    # Keeping padded columns exactly zero keeps the one-pass BN sums correct with
    # a static divisor of n_valid.
    if n_valid != npad:
        col = lax.broadcasted_iota(jnp.int32, (nh, npad), 1)
        mask = (col < n_valid).astype(jnp.float32)
    else:
        mask = None

    def fc_bn(x, i):
        # Linear (MXU).  The Linear bias is omitted: it cancels exactly inside the
        # training-mode BatchNorm that follows.
        h = jnp.dot(w_ref[i], x, preferred_element_type=jnp.float32)
        # One-pass training-mode BN statistics over the batch (lane) axis.
        s1 = jnp.sum(h, axis=1, keepdims=True)        # (nh, 1)
        s2 = jnp.sum(h * h, axis=1, keepdims=True)    # (nh, 1)
        mu = s1 * inv_n
        var = s2 * inv_n - mu * mu
        gb = gb_ref[i]                                 # (nh, 2)
        s = gb[:, 0:1] * lax.rsqrt(var + BN_EPS)       # per-feature scale
        t = gb[:, 1:2] - mu * s                        # per-feature shift
        out = h * s + t
        if mask is not None:
            out = out * mask                           # keep pad columns at zero
        return out

    x = x_ref[...].astype(jnp.float32)

    # x = relu(bn3(fc3(x)))
    x = jnp.maximum(fc_bn(x, 0), 0.0)

    # 4 residual blocks: relu(fc,bn) -> (fc,bn) -> relu(out + identity)
    for blk in range(4):
        i1 = 1 + 2 * blk
        out = jnp.maximum(fc_bn(x, i1), 0.0)
        out = fc_bn(out, i1 + 1)
        x = jnp.maximum(out + x, 0.0)

    # final Linear (bias kept; no BN / activation).  Padded columns are sliced off
    # by the wrapper.
    y = jnp.dot(wf_ref[...], x, preferred_element_type=jnp.float32) + bf_ref[...]
    o_ref[...] = y.astype(o_ref.dtype)


@jax.jit
def resgraphd_forward(x, w_stack, gb_stack, wf, bf):
    """x: (T, B, nh) or (N, nh).  Returns same leading shape with nd_out features."""
    re3 = x.ndim == 3
    if re3:
        T, B, _ = x.shape
        x2 = x.reshape(T * B, -1)
    else:
        x2 = x
    N, nh = x2.shape
    nd_out = wf.shape[0]

    # Lane-dense transposed layout: (features, batch), batch padded to a multiple
    # of 128 lanes; padded columns are zero.
    npad = ((N + 127) // 128) * 128
    xt = jnp.zeros((nh, npad), jnp.float32).at[:, :N].set(x2.T.astype(jnp.float32))

    vmem = pl.BlockSpec(memory_space=pltpu.MemorySpace.VMEM)
    out_t = pl.pallas_call(
        functools.partial(_resgraphd_kernel, n_valid=N),
        out_shape=jax.ShapeDtypeStruct((nd_out, npad), jnp.float32),
        in_specs=[vmem] * 5,
        out_specs=vmem,
        compiler_params=pltpu.CompilerParams(
            vmem_limit_bytes=32 * 1024 * 1024,
        ),
    )(xt, w_stack, gb_stack, wf, bf)

    y = out_t[:, :N].T
    if re3:
        return y.reshape(T, B, nd_out)
    return y


def make_params(key, nh, nd_out):
    """Deterministic synthetic parameters matching the PyTorch module shapes."""
    ks = jax.random.split(key, 6)
    bound = 1.0 / jnp.sqrt(nh)
    # 9 hidden Linear layers, PyTorch (out, in) layout.
    w_stack = jax.random.uniform(ks[0], (9, nh, nh), jnp.float32, -bound, bound)
    # Linear biases are kept only for the reference (they cancel inside training BN).
    b_stack = jax.random.uniform(ks[1], (9, nh), jnp.float32, -bound, bound)
    # BatchNorm affine params, packed: [..., 0] = gamma, [..., 1] = beta.
    gamma = 1.0 + 0.1 * jax.random.normal(ks[2], (9, nh), jnp.float32)
    beta = 0.1 * jax.random.normal(ks[3], (9, nh), jnp.float32)
    gb_stack = jnp.stack([gamma, beta], axis=-1)  # (9, nh, 2)
    # final Linear: PyTorch (out, in) layout; bias as a column.
    wf = jax.random.uniform(ks[4], (nd_out, nh), jnp.float32, -bound, bound)
    bf = jax.random.uniform(ks[5], (nd_out, 1), jnp.float32, -bound, bound)
    return w_stack, b_stack, gb_stack, wf, bf


def reference_forward(x, w_stack, b_stack, gb_stack, wf, bf):
    """Pure-JAX reference mirroring the PyTorch forward exactly
    (training-mode BN, Linear biases included, two-pass statistics)."""
    re3 = x.ndim == 3
    if re3:
        T, B, _ = x.shape
        x = x.reshape(T * B, -1)

    def fc_bn(h, i):
        h = h @ w_stack[i].T + b_stack[i]
        mu = jnp.mean(h, axis=0, keepdims=True)
        var = jnp.mean(jnp.square(h - mu), axis=0, keepdims=True)
        return (h - mu) * lax.rsqrt(var + BN_EPS) * gb_stack[i, :, 0] + gb_stack[i, :, 1]

    x = jax.nn.relu(fc_bn(x, 0))
    for blk in range(4):
        i1 = 1 + 2 * blk
        out = jax.nn.relu(fc_bn(x, i1))
        out = fc_bn(out, i1 + 1)
        x = jax.nn.relu(out + x)
    y = x @ wf.T + bf[:, 0]
    if re3:
        return y.reshape(T, B, -1)
    return y


if __name__ == "__main__":
    nh, nd_out = 32, 16
    T, B = 4, 4  # flattened batch N = 16

    key = jax.random.PRNGKey(0)
    k_x, k_p = jax.random.split(key)
    x = jax.random.normal(k_x, (T, B, nh), jnp.float32)
    w_stack, b_stack, gb_stack, wf, bf = make_params(k_p, nh, nd_out)

    y = resgraphd_forward(x, w_stack, gb_stack, wf, bf)
    y = jax.block_until_ready(y)

    y_ref = reference_forward(x, w_stack, b_stack, gb_stack, wf, bf)
    assert y.shape == (T, B, nd_out), y.shape
    max_err = float(jnp.max(jnp.abs(y - y_ref)))
    assert jnp.allclose(y, y_ref, atol=1e-3, rtol=1e-3), f"mismatch vs reference (max err {max_err})"

    print("KERNEL_OK")
</pallas_src>

<mosaic_0001>
module attributes {stable_mosaic.version = 11 : i64} {
  func.func @_resgraphd_kernel(%arg0: memref<32x128xf32, #tpu.memory_space<vmem>>, %arg1: memref<9x32x32xf32, #tpu.memory_space<vmem>>, %arg2: memref<9x32x2xf32, #tpu.memory_space<vmem>>, %arg3: memref<16x32xf32, #tpu.memory_space<vmem>>, %arg4: memref<16x1xf32, #tpu.memory_space<vmem>>, %arg5: memref<16x128xf32, #tpu.memory_space<vmem>>) attributes {dimension_semantics = [], scalar_prefetch = 0 : i64, scratch_operands = 0 : i64, tpu.core_type = #tpu.core_type<tc>} {
    %0 = tpu.iota {dimensions = array<i32: 1>} : vector<32x128xi32>
    %c16_i32 = arith.constant 16 : i32
    %1 = vector.broadcast %c16_i32 : i32 to vector<32x128xi32>
    %2 = arith.cmpi slt, %0, %1 : vector<32x128xi32>
    %3 = arith.extui %2 : vector<32x128xi1> to vector<32x128xi32>
    %4 = arith.sitofp %3 : vector<32x128xi32> to vector<32x128xf32>
    %c0 = arith.constant 0 : index
    %c0_0 = arith.constant 0 : index
    %5 = vector.load %arg0[%c0, %c0_0] : memref<32x128xf32, #tpu.memory_space<vmem>>, vector<32x128xf32>
    %c0_1 = arith.constant 0 : index
    %c0_2 = arith.constant 0 : index
    %c0_3 = arith.constant 0 : index
    %6 = vector.load %arg1[%c0_1, %c0_2, %c0_3] : memref<9x32x32xf32, #tpu.memory_space<vmem>>, vector<1x32x32xf32>
    %7 = vector.shape_cast %6 : vector<1x32x32xf32> to vector<32x32xf32>
    %cst = arith.constant dense<0.000000e+00> : vector<32x128xf32>
    %8 = tpu.matmul %7, %5, %cst {dimension_numbers = #tpu.dot_dimension_numbers<[1], [0], [0], [1], [0, 0, 1, 1], [], []>} : vector<32x32xf32>, vector<32x128xf32>, vector<32x128xf32> -> vector<32x128xf32>
    %cst_4 = arith.constant dense<0.000000e+00> : vector<32xf32>
    %9 = vector.multi_reduction <add>, %8, %cst_4 [1] : vector<32x128xf32> to vector<32xf32>
    %10 = vector.shape_cast %9 : vector<32xf32> to vector<32x1xf32>
    %11 = arith.mulf %8, %8 : vector<32x128xf32>
    %cst_5 = arith.constant dense<0.000000e+00> : vector<32xf32>
    %12 = vector.multi_reduction <add>, %11, %cst_5 [1] : vector<32x128xf32> to vector<32xf32>
    %13 = vector.shape_cast %12 : vector<32xf32> to vector<32x1xf32>
    %cst_6 = arith.constant 6.250000e-02 : f32
    %14 = vector.broadcast %cst_6 : f32 to vector<32x1xf32>
    %15 = arith.mulf %10, %14 : vector<32x1xf32>
    %cst_7 = arith.constant 6.250000e-02 : f32
    %16 = vector.broadcast %cst_7 : f32 to vector<32x1xf32>
    %17 = arith.mulf %13, %16 : vector<32x1xf32>
    %18 = arith.mulf %15, %15 : vector<32x1xf32>
    %19 = arith.subf %17, %18 : vector<32x1xf32>
    %c0_8 = arith.constant 0 : index
    %c0_9 = arith.constant 0 : index
    %c0_10 = arith.constant 0 : index
    %20 = vector.load %arg2[%c0_8, %c0_9, %c0_10] : memref<9x32x2xf32, #tpu.memory_space<vmem>>, vector<1x32x2xf32>
    %21 = vector.shape_cast %20 : vector<1x32x2xf32> to vector<32x2xf32>
    %22 = vector.extract_strided_slice %21 {offsets = [0, 0], sizes = [32, 1], strides = [1, 1]} : vector<32x2xf32> to vector<32x1xf32>
    %cst_11 = arith.constant 9.99999974E-6 : f32
    %23 = vector.broadcast %cst_11 : f32 to vector<32x1xf32>
    %24 = arith.addf %19, %23 : vector<32x1xf32>
    %25 = math.rsqrt %24 : vector<32x1xf32>
    %26 = arith.mulf %22, %25 : vector<32x1xf32>
    %27 = vector.extract_strided_slice %21 {offsets = [0, 1], sizes = [32, 1], strides = [1, 1]} : vector<32x2xf32> to vector<32x1xf32>
    %28 = arith.mulf %15, %26 : vector<32x1xf32>
    %29 = arith.subf %27, %28 : vector<32x1xf32>
    %30 = vector.broadcast %26 : vector<32x1xf32> to vector<32x128xf32>
    %31 = arith.mulf %8, %30 : vector<32x128xf32>
    %32 = vector.broadcast %29 : vector<32x1xf32> to vector<32x128xf32>
    %33 = arith.addf %31, %32 : vector<32x128xf32>
    %34 = arith.mulf %33, %4 : vector<32x128xf32>
    %cst_12 = arith.constant 0.000000e+00 : f32
    %35 = vector.broadcast %cst_12 : f32 to vector<32x128xf32>
    %36 = arith.maximumf %34, %35 : vector<32x128xf32>
    %c1 = arith.constant 1 : index
    %c0_13 = arith.constant 0 : index
    %c0_14 = arith.constant 0 : index
    %37 = vector.load %arg1[%c1, %c0_13, %c0_14] : memref<9x32x32xf32, #tpu.memory_space<vmem>>, vector<1x32x32xf32>
    %38 = vector.shape_cast %37 : vector<1x32x32xf32> to vector<32x32xf32>
    %cst_15 = arith.constant dense<0.000000e+00> : vector<32x128xf32>
    %39 = tpu.matmul %38, %36, %cst_15 {dimension_numbers = #tpu.dot_dimension_numbers<[1], [0], [0], [1], [0, 0, 1, 1], [], []>} : vector<32x32xf32>, vector<32x128xf32>, vector<32x128xf32> -> vector<32x128xf32>
    %cst_16 = arith.constant dense<0.000000e+00> : vector<32xf32>
    %40 = vector.multi_reduction <add>, %39, %cst_16 [1] : vector<32x128xf32> to vector<32xf32>
    %41 = vector.shape_cast %40 : vector<32xf32> to vector<32x1xf32>
    %42 = arith.mulf %39, %39 : vector<32x128xf32>
    %cst_17 = arith.constant dense<0.000000e+00> : vector<32xf32>
    %43 = vector.multi_reduction <add>, %42, %cst_17 [1] : vector<32x128xf32> to vector<32xf32>
    %44 = vector.shape_cast %43 : vector<32xf32> to vector<32x1xf32>
    %cst_18 = arith.constant 6.250000e-02 : f32
    %45 = vector.broadcast %cst_18 : f32 to vector<32x1xf32>
    %46 = arith.mulf %41, %45 : vector<32x1xf32>
    %cst_19 = arith.constant 6.250000e-02 : f32
    %47 = vector.broadcast %cst_19 : f32 to vector<32x1xf32>
    %48 = arith.mulf %44, %47 : vector<32x1xf32>
    %49 = arith.mulf %46, %46 : vector<32x1xf32>
    %50 = arith.subf %48, %49 : vector<32x1xf32>
    %c1_20 = arith.constant 1 : index
    %c0_21 = arith.constant 0 : index
    %c0_22 = arith.constant 0 : index
    %51 = vector.load %arg2[%c1_20, %c0_21, %c0_22] : memref<9x32x2xf32, #tpu.memory_space<vmem>>, vector<1x32x2xf32>
    %52 = vector.shape_cast %51 : vector<1x32x2xf32> to vector<32x2xf32>
    %53 = vector.extract_strided_slice %52 {offsets = [0, 0], sizes = [32, 1], strides = [1, 1]} : vector<32x2xf32> to vector<32x1xf32>
    %cst_23 = arith.constant 9.99999974E-6 : f32
    %54 = vector.broadcast %cst_23 : f32 to vector<32x1xf32>
    %55 = arith.addf %50, %54 : vector<32x1xf32>
    %56 = math.rsqrt %55 : vector<32x1xf32>
    %57 = arith.mulf %53, %56 : vector<32x1xf32>
    %58 = vector.extract_strided_slice %52 {offsets = [0, 1], sizes = [32, 1], strides = [1, 1]} : vector<32x2xf32> to vector<32x1xf32>
    %59 = arith.mulf %46, %57 : vector<32x1xf32>
    %60 = arith.subf %58, %59 : vector<32x1xf32>
    %61 = vector.broadcast %57 : vector<32x1xf32> to vector<32x128xf32>
    %62 = arith.mulf %39, %61 : vector<32x128xf32>
    %63 = vector.broadcast %60 : vector<32x1xf32> to vector<32x128xf32>
    %64 = arith.addf %62, %63 : vector<32x128xf32>
    %65 = arith.mulf %64, %4 : vector<32x128xf32>
    %cst_24 = arith.constant 0.000000e+00 : f32
    %66 = vector.broadcast %cst_24 : f32 to vector<32x128xf32>
    %67 = arith.maximumf %65, %66 : vector<32x128xf32>
    %c2 = arith.constant 2 : index
    %c0_25 = arith.constant 0 : index
    %c0_26 = arith.constant 0 : index
    %68 = vector.load %arg1[%c2, %c0_25, %c0_26] : memref<9x32x32xf32, #tpu.memory_space<vmem>>, vector<1x32x32xf32>
    %69 = vector.shape_cast %68 : vector<1x32x32xf32> to vector<32x32xf32>
    %cst_27 = arith.constant dense<0.000000e+00> : vector<32x128xf32>
    %70 = tpu.matmul %69, %67, %cst_27 {dimension_numbers = #tpu.dot_dimension_numbers<[1], [0], [0], [1], [0, 0, 1, 1], [], []>} : vector<32x32xf32>, vector<32x128xf32>, vector<32x128xf32> -> vector<32x128xf32>
    %cst_28 = arith.constant dense<0.000000e+00> : vector<32xf32>
    %71 = vector.multi_reduction <add>, %70, %cst_28 [1] : vector<32x128xf32> to vector<32xf32>
    %72 = vector.shape_cast %71 : vector<32xf32> to vector<32x1xf32>
    %73 = arith.mulf %70, %70 : vector<32x128xf32>
    %cst_29 = arith.constant dense<0.000000e+00> : vector<32xf32>
    %74 = vector.multi_reduction <add>, %73, %cst_29 [1] : vector<32x128xf32> to vector<32xf32>
    %75 = vector.shape_cast %74 : vector<32xf32> to vector<32x1xf32>
    %cst_30 = arith.constant 6.250000e-02 : f32
    %76 = vector.broadcast %cst_30 : f32 to vector<32x1xf32>
    %77 = arith.mulf %72, %76 : vector<32x1xf32>
    %cst_31 = arith.constant 6.250000e-02 : f32
    %78 = vector.broadcast %cst_31 : f32 to vector<32x1xf32>
    %79 = arith.mulf %75, %78 : vector<32x1xf32>
    %80 = arith.mulf %77, %77 : vector<32x1xf32>
    %81 = arith.subf %79, %80 : vector<32x1xf32>
    %c2_32 = arith.constant 2 : index
    %c0_33 = arith.constant 0 : index
    %c0_34 = arith.constant 0 : index
    %82 = vector.load %arg2[%c2_32, %c0_33, %c0_34] : memref<9x32x2xf32, #tpu.memory_space<vmem>>, vector<1x32x2xf32>
    %83 = vector.shape_cast %82 : vector<1x32x2xf32> to vector<32x2xf32>
    %84 = vector.extract_strided_slice %83 {offsets = [0, 0], sizes = [32, 1], strides = [1, 1]} : vector<32x2xf32> to vector<32x1xf32>
    %cst_35 = arith.constant 9.99999974E-6 : f32
    %85 = vector.broadcast %cst_35 : f32 to vector<32x1xf32>
    %86 = arith.addf %81, %85 : vector<32x1xf32>
    %87 = math.rsqrt %86 : vector<32x1xf32>
    %88 = arith.mulf %84, %87 : vector<32x1xf32>
    %89 = vector.extract_strided_slice %83 {offsets = [0, 1], sizes = [32, 1], strides = [1, 1]} : vector<32x2xf32> to vector<32x1xf32>
    %90 = arith.mulf %77, %88 : vector<32x1xf32>
    %91 = arith.subf %89, %90 : vector<32x1xf32>
    %92 = vector.broadcast %88 : vector<32x1xf32> to vector<32x128xf32>
    %93 = arith.mulf %70, %92 : vector<32x128xf32>
    %94 = vector.broadcast %91 : vector<32x1xf32> to vector<32x128xf32>
    %95 = arith.addf %93, %94 : vector<32x128xf32>
    %96 = arith.mulf %95, %4 : vector<32x128xf32>
    %97 = arith.addf %96, %36 : vector<32x128xf32>
    %cst_36 = arith.constant 0.000000e+00 : f32
    %98 = vector.broadcast %cst_36 : f32 to vector<32x128xf32>
    %99 = arith.maximumf %97, %98 : vector<32x128xf32>
    %c3 = arith.constant 3 : index
    %c0_37 = arith.constant 0 : index
    %c0_38 = arith.constant 0 : index
    %100 = vector.load %arg1[%c3, %c0_37, %c0_38] : memref<9x32x32xf32, #tpu.memory_space<vmem>>, vector<1x32x32xf32>
    %101 = vector.shape_cast %100 : vector<1x32x32xf32> to vector<32x32xf32>
    %cst_39 = arith.constant dense<0.000000e+00> : vector<32x128xf32>
    %102 = tpu.matmul %101, %99, %cst_39 {dimension_numbers = #tpu.dot_dimension_numbers<[1], [0], [0], [1], [0, 0, 1, 1], [], []>} : vector<32x32xf32>, vector<32x128xf32>, vector<32x128xf32> -> vector<32x128xf32>
    %cst_40 = arith.constant dense<0.000000e+00> : vector<32xf32>
    %103 = vector.multi_reduction <add>, %102, %cst_40 [1] : vector<32x128xf32> to vector<32xf32>
    %104 = vector.shape_cast %103 : vector<32xf32> to vector<32x1xf32>
    %105 = arith.mulf %102, %102 : vector<32x128xf32>
    %cst_41 = arith.constant dense<0.000000e+00> : vector<32xf32>
    %106 = vector.multi_reduction <add>, %105, %cst_41 [1] : vector<32x128xf32> to vector<32xf32>
    %107 = vector.shape_cast %106 : vector<32xf32> to vector<32x1xf32>
    %cst_42 = arith.constant 6.250000e-02 : f32
    %108 = vector.broadcast %cst_42 : f32 to vector<32x1xf32>
    %109 = arith.mulf %104, %108 : vector<32x1xf32>
    %cst_43 = arith.constant 6.250000e-02 : f32
    %110 = vector.broadcast %cst_43 : f32 to vector<32x1xf32>
    %111 = arith.mulf %107, %110 : vector<32x1xf32>
    %112 = arith.mulf %109, %109 : vector<32x1xf32>
    %113 = arith.subf %111, %112 : vector<32x1xf32>
    %c3_44 = arith.constant 3 : index
    %c0_45 = arith.constant 0 : index
    %c0_46 = arith.constant 0 : index
    %114 = vector.load %arg2[%c3_44, %c0_45, %c0_46] : memref<9x32x2xf32, #tpu.memory_space<vmem>>, vector<1x32x2xf32>
    %115 = vector.shape_cast %114 : vector<1x32x2xf32> to vector<32x2xf32>
    %116 = vector.extract_strided_slice %115 {offsets = [0, 0], sizes = [32, 1], strides = [1, 1]} : vector<32x2xf32> to vector<32x1xf32>
    %cst_47 = arith.constant 9.99999974E-6 : f32
    %117 = vector.broadcast %cst_47 : f32 to vector<32x1xf32>
    %118 = arith.addf %113, %117 : vector<32x1xf32>
    %119 = math.rsqrt %118 : vector<32x1xf32>
    %120 = arith.mulf %116, %119 : vector<32x1xf32>
    %121 = vector.extract_strided_slice %115 {offsets = [0, 1], sizes = [32, 1], strides = [1, 1]} : vector<32x2xf32> to vector<32x1xf32>
    %122 = arith.mulf %109, %120 : vector<32x1xf32>
    %123 = arith.subf %121, %122 : vector<32x1xf32>
    %124 = vector.broadcast %120 : vector<32x1xf32> to vector<32x128xf32>
    %125 = arith.mulf %102, %124 : vector<32x128xf32>
    %126 = vector.broadcast %123 : vector<32x1xf32> to vector<32x128xf32>
    %127 = arith.addf %125, %126 : vector<32x128xf32>
    %128 = arith.mulf %127, %4 : vector<32x128xf32>
    %cst_48 = arith.constant 0.000000e+00 : f32
    %129 = vector.broadcast %cst_48 : f32 to vector<32x128xf32>
    %130 = arith.maximumf %128, %129 : vector<32x128xf32>
    %c4 = arith.constant 4 : index
    %c0_49 = arith.constant 0 : index
    %c0_50 = arith.constant 0 : index
    %131 = vector.load %arg1[%c4, %c0_49, %c0_50] : memref<9x32x32xf32, #tpu.memory_space<vmem>>, vector<1x32x32xf32>
    %132 = vector.shape_cast %131 : vector<1x32x32xf32> to vector<32x32xf32>
    %cst_51 = arith.constant dense<0.000000e+00> : vector<32x128xf32>
    %133 = tpu.matmul %132, %130, %cst_51 {dimension_numbers = #tpu.dot_dimension_numbers<[1], [0], [0], [1], [0, 0, 1, 1], [], []>} : vector<32x32xf32>, vector<32x128xf32>, vector<32x128xf32> -> vector<32x128xf32>
    %cst_52 = arith.constant dense<0.000000e+00> : vector<32xf32>
    %134 = vector.multi_reduction <add>, %133, %cst_52 [1] : vector<32x128xf32> to vector<32xf32>
    %135 = vector.shape_cast %134 : vector<32xf32> to vector<32x1xf32>
    %136 = arith.mulf %133, %133 : vector<32x128xf32>
    %cst_53 = arith.constant dense<0.000000e+00> : vector<32xf32>
    %137 = vector.multi_reduction <add>, %136, %cst_53 [1] : vector<32x128xf32> to vector<32xf32>
    %138 = vector.shape_cast %137 : vector<32xf32> to vector<32x1xf32>
    %cst_54 = arith.constant 6.250000e-02 : f32
    %139 = vector.broadcast %cst_54 : f32 to vector<32x1xf32>
    %140 = arith.mulf %135, %139 : vector<32x1xf32>
    %cst_55 = arith.constant 6.250000e-02 : f32
    %141 = vector.broadcast %cst_55 : f32 to vector<32x1xf32>
    %142 = arith.mulf %138, %141 : vector<32x1xf32>
    %143 = arith.mulf %140, %140 : vector<32x1xf32>
    %144 = arith.subf %142, %143 : vector<32x1xf32>
    %c4_56 = arith.constant 4 : index
    %c0_57 = arith.constant 0 : index
    %c0_58 = arith.constant 0 : index
    %145 = vector.load %arg2[%c4_56, %c0_57, %c0_58] : memref<9x32x2xf32, #tpu.memory_space<vmem>>, vector<1x32x2xf32>
    %146 = vector.shape_cast %145 : vector<1x32x2xf32> to vector<32x2xf32>
    %147 = vector.extract_strided_slice %146 {offsets = [0, 0], sizes = [32, 1], strides = [1, 1]} : vector<32x2xf32> to vector<32x1xf32>
    %cst_59 = arith.constant 9.99999974E-6 : f32
    %148 = vector.broadcast %cst_59 : f32 to vector<32x1xf32>
    %149 = arith.addf %144, %148 : vector<32x1xf32>
    %150 = math.rsqrt %149 : vector<32x1xf32>
    %151 = arith.mulf %147, %150 : vector<32x1xf32>
    %152 = vector.extract_strided_slice %146 {offsets = [0, 1], sizes = [32, 1], strides = [1, 1]} : vector<32x2xf32> to vector<32x1xf32>
    %153 = arith.mulf %140, %151 : vector<32x1xf32>
    %154 = arith.subf %152, %153 : vector<32x1xf32>
    %155 = vector.broadcast %151 : vector<32x1xf32> to vector<32x128xf32>
    %156 = arith.mulf %133, %155 : vector<32x128xf32>
    %157 = vector.broadcast %154 : vector<32x1xf32> to vector<32x128xf32>
    %158 = arith.addf %156, %157 : vector<32x128xf32>
    %159 = arith.mulf %158, %4 : vector<32x128xf32>
    %160 = arith.addf %159, %99 : vector<32x128xf32>
    %cst_60 = arith.constant 0.000000e+00 : f32
    %161 = vector.broadcast %cst_60 : f32 to vector<32x128xf32>
    %162 = arith.maximumf %160, %161 : vector<32x128xf32>
    %c5 = arith.constant 5 : index
    %c0_61 = arith.constant 0 : index
    %c0_62 = arith.constant 0 : index
    %163 = vector.load %arg1[%c5, %c0_61, %c0_62] : memref<9x32x32xf32, #tpu.memory_space<vmem>>, vector<1x32x32xf32>
    %164 = vector.shape_cast %163 : vector<1x32x32xf32> to vector<32x32xf32>
    %cst_63 = arith.constant dense<0.000000e+00> : vector<32x128xf32>
    %165 = tpu.matmul %164, %162, %cst_63 {dimension_numbers = #tpu.dot_dimension_numbers<[1], [0], [0], [1], [0, 0, 1, 1], [], []>} : vector<32x32xf32>, vector<32x128xf32>, vector<32x128xf32> -> vector<32x128xf32>
    %cst_64 = arith.constant dense<0.000000e+00> : vector<32xf32>
    %166 = vector.multi_reduction <add>, %165, %cst_64 [1] : vector<32x128xf32> to vector<32xf32>
    %167 = vector.shape_cast %166 : vector<32xf32> to vector<32x1xf32>
    %168 = arith.mulf %165, %165 : vector<32x128xf32>
    %cst_65 = arith.constant dense<0.000000e+00> : vector<32xf32>
    %169 = vector.multi_reduction <add>, %168, %cst_65 [1] : vector<32x128xf32> to vector<32xf32>
    %170 = vector.shape_cast %169 : vector<32xf32> to vector<32x1xf32>
    %cst_66 = arith.constant 6.250000e-02 : f32
    %171 = vector.broadcast %cst_66 : f32 to vector<32x1xf32>
    %172 = arith.mulf %167, %171 : vector<32x1xf32>
    %cst_67 = arith.constant 6.250000e-02 : f32
    %173 = vector.broadcast %cst_67 : f32 to vector<32x1xf32>
    %174 = arith.mulf %170, %173 : vector<32x1xf32>
    %175 = arith.mulf %172, %172 : vector<32x1xf32>
    %176 = arith.subf %174, %175 : vector<32x1xf32>
    %c5_68 = arith.constant 5 : index
    %c0_69 = arith.constant 0 : index
    %c0_70 = arith.constant 0 : index
    %177 = vector.load %arg2[%c5_68, %c0_69, %c0_70] : memref<9x32x2xf32, #tpu.memory_space<vmem>>, vector<1x32x2xf32>
    %178 = vector.shape_cast %177 : vector<1x32x2xf32> to vector<32x2xf32>
    %179 = vector.extract_strided_slice %178 {offsets = [0, 0], sizes = [32, 1], strides = [1, 1]} : vector<32x2xf32> to vector<32x1xf32>
    %cst_71 = arith.constant 9.99999974E-6 : f32
    %180 = vector.broadcast %cst_71 : f32 to vector<32x1xf32>
    %181 = arith.addf %176, %180 : vector<32x1xf32>
    %182 = math.rsqrt %181 : vector<32x1xf32>
    %183 = arith.mulf %179, %182 : vector<32x1xf32>
    %184 = vector.extract_strided_slice %178 {offsets = [0, 1], sizes = [32, 1], strides = [1, 1]} : vector<32x2xf32> to vector<32x1xf32>
    %185 = arith.mulf %172, %183 : vector<32x1xf32>
    %186 = arith.subf %184, %185 : vector<32x1xf32>
    %187 = vector.broadcast %183 : vector<32x1xf32> to vector<32x128xf32>
    %188 = arith.mulf %165, %187 : vector<32x128xf32>
    %189 = vector.broadcast %186 : vector<32x1xf32> to vector<32x128xf32>
    %190 = arith.addf %188, %189 : vector<32x128xf32>
    %191 = arith.mulf %190, %4 : vector<32x128xf32>
    %cst_72 = arith.constant 0.000000e+00 : f32
    %192 = vector.broadcast %cst_72 : f32 to vector<32x128xf32>
    %193 = arith.maximumf %191, %192 : vector<32x128xf32>
    %c6 = arith.constant 6 : index
    %c0_73 = arith.constant 0 : index
    %c0_74 = arith.constant 0 : index
    %194 = vector.load %arg1[%c6, %c0_73, %c0_74] : memref<9x32x32xf32, #tpu.memory_space<vmem>>, vector<1x32x32xf32>
    %195 = vector.shape_cast %194 : vector<1x32x32xf32> to vector<32x32xf32>
    %cst_75 = arith.constant dense<0.000000e+00> : vector<32x128xf32>
    %196 = tpu.matmul %195, %193, %cst_75 {dimension_numbers = #tpu.dot_dimension_numbers<[1], [0], [0], [1], [0, 0, 1, 1], [], []>} : vector<32x32xf32>, vector<32x128xf32>, vector<32x128xf32> -> vector<32x128xf32>
    %cst_76 = arith.constant dense<0.000000e+00> : vector<32xf32>
    %197 = vector.multi_reduction <add>, %196, %cst_76 [1] : vector<32x128xf32> to vector<32xf32>
    %198 = vector.shape_cast %197 : vector<32xf32> to vector<32x1xf32>
    %199 = arith.mulf %196, %196 : vector<32x128xf32>
    %cst_77 = arith.constant dense<0.000000e+00> : vector<32xf32>
    %200 = vector.multi_reduction <add>, %199, %cst_77 [1] : vector<32x128xf32> to vector<32xf32>
    %201 = vector.shape_cast %200 : vector<32xf32> to vector<32x1xf32>
    %cst_78 = arith.constant 6.250000e-02 : f32
    %202 = vector.broadcast %cst_78 : f32 to vector<32x1xf32>
    %203 = arith.mulf %198, %202 : vector<32x1xf32>
    %cst_79 = arith.constant 6.250000e-02 : f32
    %204 = vector.broadcast %cst_79 : f32 to vector<32x1xf32>
    %205 = arith.mulf %201, %204 : vector<32x1xf32>
    %206 = arith.mulf %203, %203 : vector<32x1xf32>
    %207 = arith.subf %205, %206 : vector<32x1xf32>
    %c6_80 = arith.constant 6 : index
    %c0_81 = arith.constant 0 : index
    %c0_82 = arith.constant 0 : index
    %208 = vector.load %arg2[%c6_80, %c0_81, %c0_82] : memref<9x32x2xf32, #tpu.memory_space<vmem>>, vector<1x32x2xf32>
    %209 = vector.shape_cast %208 : vector<1x32x2xf32> to vector<32x2xf32>
    %210 = vector.extract_strided_slice %209 {offsets = [0, 0], sizes = [32, 1], strides = [1, 1]} : vector<32x2xf32> to vector<32x1xf32>
    %cst_83 = arith.constant 9.99999974E-6 : f32
    %211 = vector.broadcast %cst_83 : f32 to vector<32x1xf32>
    %212 = arith.addf %207, %211 : vector<32x1xf32>
    %213 = math.rsqrt %212 : vector<32x1xf32>
    %214 = arith.mulf %210, %213 : vector<32x1xf32>
    %215 = vector.extract_strided_slice %209 {offsets = [0, 1], sizes = [32, 1], strides = [1, 1]} : vector<32x2xf32> to vector<32x1xf32>
    %216 = arith.mulf %203, %214 : vector<32x1xf32>
    %217 = arith.subf %215, %216 : vector<32x1xf32>
    %218 = vector.broadcast %214 : vector<32x1xf32> to vector<32x128xf32>
    %219 = arith.mulf %196, %218 : vector<32x128xf32>
    %220 = vector.broadcast %217 : vector<32x1xf32> to vector<32x128xf32>
    %221 = arith.addf %219, %220 : vector<32x128xf32>
    %222 = arith.mulf %221, %4 : vector<32x128xf32>
    %223 = arith.addf %222, %162 : vector<32x128xf32>
    %cst_84 = arith.constant 0.000000e+00 : f32
    %224 = vector.broadcast %cst_84 : f32 to vector<32x128xf32>
    %225 = arith.maximumf %223, %224 : vector<32x128xf32>
    %c7 = arith.constant 7 : index
    %c0_85 = arith.constant 0 : index
    %c0_86 = arith.constant 0 : index
    %226 = vector.load %arg1[%c7, %c0_85, %c0_86] : memref<9x32x32xf32, #tpu.memory_space<vmem>>, vector<1x32x32xf32>
    %227 = vector.shape_cast %226 : vector<1x32x32xf32> to vector<32x32xf32>
    %cst_87 = arith.constant dense<0.000000e+00> : vector<32x128xf32>
    %228 = tpu.matmul %227, %225, %cst_87 {dimension_numbers = #tpu.dot_dimension_numbers<[1], [0], [0], [1], [0, 0, 1, 1], [], []>} : vector<32x32xf32>, vector<32x128xf32>, vector<32x128xf32> -> vector<32x128xf32>
    %cst_88 = arith.constant dense<0.000000e+00> : vector<32xf32>
    %229 = vector.multi_reduction <add>, %228, %cst_88 [1] : vector<32x128xf32> to vector<32xf32>
    %230 = vector.shape_cast %229 : vector<32xf32> to vector<32x1xf32>
    %231 = arith.mulf %228, %228 : vector<32x128xf32>
    %cst_89 = arith.constant dense<0.000000e+00> : vector<32xf32>
    %232 = vector.multi_reduction <add>, %231, %cst_89 [1] : vector<32x128xf32> to vector<32xf32>
    %233 = vector.shape_cast %232 : vector<32xf32> to vector<32x1xf32>
    %cst_90 = arith.constant 6.250000e-02 : f32
    %234 = vector.broadcast %cst_90 : f32 to vector<32x1xf32>
    %235 = arith.mulf %230, %234 : vector<32x1xf32>
    %cst_91 = arith.constant 6.250000e-02 : f32
    %236 = vector.broadcast %cst_91 : f32 to vector<32x1xf32>
    %237 = arith.mulf %233, %236 : vector<32x1xf32>
    %238 = arith.mulf %235, %235 : vector<32x1xf32>
    %239 = arith.subf %237, %238 : vector<32x1xf32>
    %c7_92 = arith.constant 7 : index
    %c0_93 = arith.constant 0 : index
    %c0_94 = arith.constant 0 : index
    %240 = vector.load %arg2[%c7_92, %c0_93, %c0_94] : memref<9x32x2xf32, #tpu.memory_space<vmem>>, vector<1x32x2xf32>
    %241 = vector.shape_cast %240 : vector<1x32x2xf32> to vector<32x2xf32>
    %242 = vector.extract_strided_slice %241 {offsets = [0, 0], sizes = [32, 1], strides = [1, 1]} : vector<32x2xf32> to vector<32x1xf32>
    %cst_95 = arith.constant 9.99999974E-6 : f32
    %243 = vector.broadcast %cst_95 : f32 to vector<32x1xf32>
    %244 = arith.addf %239, %243 : vector<32x1xf32>
    %245 = math.rsqrt %244 : vector<32x1xf32>
    %246 = arith.mulf %242, %245 : vector<32x1xf32>
    %247 = vector.extract_strided_slice %241 {offsets = [0, 1], sizes = [32, 1], strides = [1, 1]} : vector<32x2xf32> to vector<32x1xf32>
    %248 = arith.mulf %235, %246 : vector<32x1xf32>
    %249 = arith.subf %247, %248 : vector<32x1xf32>
    %250 = vector.broadcast %246 : vector<32x1xf32> to vector<32x128xf32>
    %251 = arith.mulf %228, %250 : vector<32x128xf32>
    %252 = vector.broadcast %249 : vector<32x1xf32> to vector<32x128xf32>
    %253 = arith.addf %251, %252 : vector<32x128xf32>
    %254 = arith.mulf %253, %4 : vector<32x128xf32>
    %cst_96 = arith.constant 0.000000e+00 : f32
    %255 = vector.broadcast %cst_96 : f32 to vector<32x128xf32>
    %256 = arith.maximumf %254, %255 : vector<32x128xf32>
    %c8 = arith.constant 8 : index
    %c0_97 = arith.constant 0 : index
    %c0_98 = arith.constant 0 : index
    %257 = vector.load %arg1[%c8, %c0_97, %c0_98] : memref<9x32x32xf32, #tpu.memory_space<vmem>>, vector<1x32x32xf32>
    %258 = vector.shape_cast %257 : vector<1x32x32xf32> to vector<32x32xf32>
    %cst_99 = arith.constant dense<0.000000e+00> : vector<32x128xf32>
    %259 = tpu.matmul %258, %256, %cst_99 {dimension_numbers = #tpu.dot_dimension_numbers<[1], [0], [0], [1], [0, 0, 1, 1], [], []>} : vector<32x32xf32>, vector<32x128xf32>, vector<32x128xf32> -> vector<32x128xf32>
    %cst_100 = arith.constant dense<0.000000e+00> : vector<32xf32>
    %260 = vector.multi_reduction <add>, %259, %cst_100 [1] : vector<32x128xf32> to vector<32xf32>
    %261 = vector.shape_cast %260 : vector<32xf32> to vector<32x1xf32>
    %262 = arith.mulf %259, %259 : vector<32x128xf32>
    %cst_101 = arith.constant dense<0.000000e+00> : vector<32xf32>
    %263 = vector.multi_reduction <add>, %262, %cst_101 [1] : vector<32x128xf32> to vector<32xf32>
    %264 = vector.shape_cast %263 : vector<32xf32> to vector<32x1xf32>
    %cst_102 = arith.constant 6.250000e-02 : f32
    %265 = vector.broadcast %cst_102 : f32 to vector<32x1xf32>
    %266 = arith.mulf %261, %265 : vector<32x1xf32>
    %cst_103 = arith.constant 6.250000e-02 : f32
    %267 = vector.broadcast %cst_103 : f32 to vector<32x1xf32>
    %268 = arith.mulf %264, %267 : vector<32x1xf32>
    %269 = arith.mulf %266, %266 : vector<32x1xf32>
    %270 = arith.subf %268, %269 : vector<32x1xf32>
    %c8_104 = arith.constant 8 : index
    %c0_105 = arith.constant 0 : index
    %c0_106 = arith.constant 0 : index
    %271 = vector.load %arg2[%c8_104, %c0_105, %c0_106] : memref<9x32x2xf32, #tpu.memory_space<vmem>>, vector<1x32x2xf32>
    %272 = vector.shape_cast %271 : vector<1x32x2xf32> to vector<32x2xf32>
    %273 = vector.extract_strided_slice %272 {offsets = [0, 0], sizes = [32, 1], strides = [1, 1]} : vector<32x2xf32> to vector<32x1xf32>
    %cst_107 = arith.constant 9.99999974E-6 : f32
    %274 = vector.broadcast %cst_107 : f32 to vector<32x1xf32>
    %275 = arith.addf %270, %274 : vector<32x1xf32>
    %276 = math.rsqrt %275 : vector<32x1xf32>
    %277 = arith.mulf %273, %276 : vector<32x1xf32>
    %278 = vector.extract_strided_slice %272 {offsets = [0, 1], sizes = [32, 1], strides = [1, 1]} : vector<32x2xf32> to vector<32x1xf32>
    %279 = arith.mulf %266, %277 : vector<32x1xf32>
    %280 = arith.subf %278, %279 : vector<32x1xf32>
    %281 = vector.broadcast %277 : vector<32x1xf32> to vector<32x128xf32>
    %282 = arith.mulf %259, %281 : vector<32x128xf32>
    %283 = vector.broadcast %280 : vector<32x1xf32> to vector<32x128xf32>
    %284 = arith.addf %282, %283 : vector<32x128xf32>
    %285 = arith.mulf %284, %4 : vector<32x128xf32>
    %286 = arith.addf %285, %225 : vector<32x128xf32>
    %cst_108 = arith.constant 0.000000e+00 : f32
    %287 = vector.broadcast %cst_108 : f32 to vector<32x128xf32>
    %288 = arith.maximumf %286, %287 : vector<32x128xf32>
    %c0_109 = arith.constant 0 : index
    %c0_110 = arith.constant 0 : index
    %289 = vector.load %arg3[%c0_109, %c0_110] : memref<16x32xf32, #tpu.memory_space<vmem>>, vector<16x32xf32>
    %cst_111 = arith.constant dense<0.000000e+00> : vector<16x128xf32>
    %290 = tpu.matmul %289, %288, %cst_111 {dimension_numbers = #tpu.dot_dimension_numbers<[1], [0], [0], [1], [0, 0, 1, 1], [], []>} : vector<16x32xf32>, vector<32x128xf32>, vector<16x128xf32> -> vector<16x128xf32>
    %c0_112 = arith.constant 0 : index
    %c0_113 = arith.constant 0 : index
    %291 = vector.load %arg4[%c0_112, %c0_113] : memref<16x1xf32, #tpu.memory_space<vmem>>, vector<16x1xf32>
    %292 = vector.broadcast %291 : vector<16x1xf32> to vector<16x128xf32>
    %293 = arith.addf %290, %292 : vector<16x128xf32>
    %c0_114 = arith.constant 0 : index
    %c0_115 = arith.constant 0 : index
    %294 = vector.load %arg5[%c0_114, %c0_115] : memref<16x128xf32, #tpu.memory_space<vmem>>, vector<16x128xf32>
    tpu.vector_store %arg5[%c0_114, %c0_115], %293 {strides = array<i32>} : memref<16x128xf32, #tpu.memory_space<vmem>>, vector<16x128xf32>,
    return
  }
}

</mosaic_0001>

<bundles_post_ra>
// kernel: resgraphd_forward.1
= control target key start
LH: loop header
LB: loop body
LE: loop exit
PB: predicated region body
PF: predicated region fallthrough
CT: control target
= control target key end

     0   :  { %vm33_vm0 = vcmask 261120   ;;  %v2772_v18 = vmov 0   ;;  %s2773_s12 = smov 1   ;;  %v2774_v63 = vmov 1   ;;  %s3530_s0 = inlined_call_operand.vmem [shape: f32[32,128], index: 0, kind: input, shape index: {}]   ;;  %s3531_s1 = inlined_call_operand.vmem [shape: f32[9,32,32], index: 1, kind: input, shape index: {}]   ;;  %s3532_s2 = inlined_call_operand.vmem [shape: f32[9,32,2], index: 2, kind: input, shape index: {}]   ;;  %s3533_s3 = inlined_call_operand.vmem [shape: f32[16,32], index: 3, kind: input, shape index: {}]   ;;  %s3534_s4 = inlined_call_operand.vmem [shape: f32[16,1], index: 4, kind: input, shape index: {}]   ;;  %s3535_s5 = inlined_call_operand.vmem [shape: f32[16,128], index: 5, kind: output, shape index: {}]  }
   0x1   :  { %v25_v0 = vld [vmem:[%s3530_s0] sm:$0xff]  ;;  %v26_v1 = vld [vmem:[%s3530_s0 + $0x8] sm:$0xff]  ;;  %v27_v2 = vld [vmem:[%s3530_s0 + $0x10] sm:$0xff]  ;;  %2662 = vset.pattern.permute.xlu0 %v2772_v18  ;;  %2663 = vset.pattern.permute.xlu1 %v2772_v18 }
   0x2   :  { %v2578_v3 = vpack.c.bf16 %v26_v1, %v25_v0  ;;  %v28_v4 = vld [vmem:[%s3530_s0 + $0x18] sm:$0xff]  ;;  %v29_v5 = vld [vmem:[%s3531_s1] sm:$0xff]  ;;  %v30_v7 = vld [vmem:[%s3531_s1 + $0x8] sm:$0xff] }
   0x3   :  { %v2582_v6 = vpack.c.bf16 %v28_v4, %v27_v2  ;;  %2449 = vmatprep.mubr.msk.f32.mxu0 %vm33_vm0, %v29_v5  ;;  %v31_v8 = vld [vmem:[%s3531_s1 + $0x10] sm:$0xff]  ;;  %v32_v9 = vld [vmem:[%s3531_s1 + $0x18] sm:$0xff]  ;;  %v168_v46 = vld [vmem:[%s3532_s2 + $0x8] sm:$0xff] }
   0x4   :  { %2579 = vmatprep.subr.bf16.mxu0 %v2578_v3  ;;  %v167_v50 = vld [vmem:[%s3532_s2] sm:$0xff]  ;;  %v169_v55 = vld [vmem:[%s3532_s2 + $0x10] sm:$0xff]  ;;  %v170_v57 = vld [vmem:[%s3532_s2 + $0x18] sm:$0xff] }
   0x5   :  { %2581 = vmatpush3.bf16.msra.mxu0 %v2578_v3 }
   0x6   :  { %2583 = vmatprep.subr.bf16.mxu0 %v2582_v6 }
   0x9   :  { %2585 = vmatpush3.bf16.msra.mxu0 %v2582_v6 }
   0xc   :  { %2450 = vmatmul.mubr.msk.f32.vlgmr.msra.gmra.mrb[0].mxu0 %vm33_vm0, %v30_v7 }
   0xd   :  { %2452 = vmatprep.mubr.msk.f32.mxu0 %vm33_vm0, %v31_v8  ;;  %v2265_v8 = vld [vmem:[%s3531_s1 + $0x20] sm:$0xff] }
   0xe   :  { %2463 = vmatprep.mubr.msk.f32.mxu1 %vm33_vm0, %v2265_v8 }
  0x10   :  { %2453 = vmatmul.mubr.msk.f32.gmra.mrb[2].mxu0 %vm33_vm0, %v32_v9 }
  0xdf   :  { %v2834_v10 = vpop.f32.mrb[0].mxu0 }
  0xe0   :  { %133 = vadd.xlane.f32.xlu0 %v2834_v10  ;;  %v2837_v11 = vpop.f32.mrb[1].mxu0  ;;  %v140_v12 = vmul.f32 %v2834_v10, %v2834_v10 }
  0xe1   :  { %v139_v14 = vmul.f32 %v2837_v11, %v2837_v11 }
  0xe2   :  { %145 = vadd.xlane.f32.xlu1 %v140_v12  ;;  %v20_v12 = vlaneseq }
  0xe3   :  { %v2841_v13 = vpop.f32.mrb[2].mxu0 }
  0xe4   :  { %131 = vadd.xlane.f32.xlu0 %v2837_v11  ;;  %v2846_v15 = vpop.f32.mrb[3].mxu0  ;;  %v142_v17 = vmul.f32 %v2841_v13, %v2841_v13 }
  0xe5   :  { %v141_v16 = vmul.f32 %v2846_v15, %v2846_v15 }
  0xe6   :  { %143 = vadd.xlane.f32.xlu1 %v139_v14 }
  0xe8   :  { %135 = vadd.xlane.f32.xlu0 %v2846_v15 }
  0xea   :  { %137 = vadd.xlane.f32.xlu1 %v2841_v13 }
  0xec   :  { %147 = vadd.xlane.f32.xlu0 %v141_v16  ;;  %v21_v16 = vand.u32 127, %v20_v12 }
  0xee   :  { %149 = vadd.xlane.f32.xlu1 %v142_v17  ;;  %vm22_vm1 = vcmp.lt.s32.totalorder %v21_v16, 16 }
 0x16d   :  { %v134_v19 = vpop.xlane.xlu0 %133 }
 0x16e   :  { %v152_v20 = vmul.f32 0.0625, %v134_v19 }
 0x16f   :  { %v146_v21 = vpop.xlane.xlu1 %145 }
 0x170   :  { %v160_v22 = vmul.f32 %v152_v20, %v152_v20  ;;  %v156_v23 = vmul.f32 0.0625, %v146_v21 }
 0x171   :  { %v132_v24 = vpop.xlane.xlu0 %131 }
 0x172   :  { %v164_v25 = vsub.f32 %v156_v23, %v160_v22  ;;  %v151_v26 = vmul.f32 0.0625, %v132_v24  ;;  %v2775_v23 = vmov 0.0  }
 0x173   :  { %v144_v27 = vpop.xlane.xlu1 %143  ;;  %v2881_v24 = vsel %vm22_vm1, 1.0, %v2775_v23 }
 0x174   :  { %v172_v28 = vadd.f32 1e-05, %v164_v25  ;;  %v159_v29 = vmul.f32 %v151_v26, %v151_v26  ;;  %v155_v30 = vmul.f32 0.0625, %v144_v27 }
 0x175   :  { %v136_v31 = vpop.xlane.xlu0 %135 }
 0x176   :  { %2700 = vrsqrt.f32 %v172_v28  ;;  %v163_v32 = vsub.f32 %v155_v30, %v159_v29  ;;  %v153_v33 = vmul.f32 0.0625, %v136_v31 }
 0x177   :  { %v138_v34 = vpop.xlane.xlu1 %137 }
 0x178   :  { %v171_v35 = vadd.f32 1e-05, %v163_v32  ;;  %v154_v36 = vmul.f32 0.0625, %v138_v34  ;;  %v161_v38 = vmul.f32 %v153_v33, %v153_v33 }
 0x179   :  { %v148_v37 = vpop.xlane.xlu0 %147 }
 0x17a   :  { %2702 = vrsqrt.f32 %v171_v35  ;;  %v157_v39 = vmul.f32 0.0625, %v148_v37  ;;  %v162_v41 = vmul.f32 %v154_v36, %v154_v36 }
 0x17b   :  { %v150_v40 = vpop.xlane.xlu1 %149 }
 0x17c   :  { %v165_v42 = vsub.f32 %v157_v39, %v161_v38  ;;  %v158_v43 = vmul.f32 0.0625, %v150_v40 }
 0x17e   :  { %v173_v44 = vadd.f32 1e-05, %v165_v42  ;;  %v166_v45 = vsub.f32 %v158_v43, %v162_v41  ;;  %v2267_v41 = vld [vmem:[%s3531_s1 + $0x30] sm:$0xff]  ;;  %v2268_v42 = vld [vmem:[%s3531_s1 + $0x38] sm:$0xff] }
 0x180   :  { %v2701_v47 = vpop.eup %2700  ;;  %2704 = vrsqrt.f32 %v173_v44  ;;  %v174_v48 = vadd.f32 1e-05, %v166_v45 }
 0x181   :  { %v180_v49 = vmul.f32 %v2701_v47, %v168_v46 }
 0x182   :  { %2706 = vrsqrt.f32 %v174_v48 }
 0x183   :  { %v184_v51 = vmul.f32 %v180_v49, %v152_v20 }
 0x184   :  { %v2703_v52 = vpop.eup %2702 }
 0x185   :  { %193 = vrot.lane.b32.xlu1 %v184_v51, %s2773_s12  ;;  %v179_v53 = vmul.f32 %v2703_v52, %v167_v50 }
 0x187   :  { %v183_v54 = vmul.f32 %v179_v53, %v151_v26 }
 0x189   :  { %191 = vrot.lane.b32.xlu0 %v183_v54, %s2773_s12 }
 0x18a   :  { %v2705_v56 = vpop.eup %2704 }
 0x18b   :  { %v181_v58 = vmul.f32 %v2705_v56, %v169_v55 }
 0x18c   :  { %v2707_v59 = vpop.eup %2706 }
 0x18d   :  { %209 = vperm.xlu0 %2662, %v179_v53   ;;  %v185_v60 = vmul.f32 %v181_v58, %v153_v33  ;;  %v182_v61 = vmul.f32 %v2707_v59, %v170_v57 }
 0x18f   :  { %195 = vrot.lane.b32.xlu1 %v185_v60, %s2773_s12  ;;  %v186_v62 = vmul.f32 %v182_v61, %v154_v36 }
 0x191   :  { %2664 = vset.pattern.permute.xlu0 %v2774_v63 }
 0x193   :  { %197 = vrot.lane.b32.xlu1 %v186_v62, %s2773_s12 }
 0x197   :  { %214 = vperm.xlu1 %2663, %v180_v49  }
 0x19b   :  { %219 = vperm.xlu1 %2663, %v181_v58  }
 0x19f   :  { %224 = vperm.xlu1 %2663, %v182_v61  }
 0x1a3   :  { %2665 = vset.pattern.permute.xlu1 %v2774_v63 }
 0x1f7   :  { %v194_v0 = vpop.permute.xlu1 %193 }
 0x1f8   :  { %v204_v1 = vsub.f32 %v168_v46, %v194_v0 }
 0x1fa   :  { %238 = vperm.xlu0 %2664, %v204_v1  }
 0x1fb   :  { %v192_v2 = vpop.permute.xlu0 %191 }
 0x1fc   :  { %v203_v3 = vsub.f32 %v167_v50, %v192_v2 }
 0x1fe   :  { %233 = vperm.xlu1 %2665, %v203_v3  }
 0x201   :  { %v196_v4 = vpop.permute.xlu1 %195 }
 0x202   :  { %v205_v5 = vsub.f32 %v169_v55, %v196_v4 }
 0x204   :  { %243 = vperm.xlu0 %2664, %v205_v5  }
 0x205   :  { %v198_v6 = vpop.permute.xlu1 %197 }
 0x206   :  { %v206_v7 = vsub.f32 %v170_v57, %v198_v6 }
 0x208   :  { %248 = vperm.xlu1 %2665, %v206_v7   ;;  %2666 = vset.pattern.permute.xlu0 %v2772_v18 }
 0x20c   :  { %2667 = vset.pattern.permute.xlu1 %v2772_v18  ;;  %v210_v17 = vpop.permute.xlu0 %209 }
 0x20d   :  { %v227_v25 = vmul.f32 %v210_v17, %v2837_v11 }
 0x216   :  { %v215_v9 = vpop.permute.xlu1 %214 }
 0x217   :  { %v228_v19 = vmul.f32 %v2834_v10, %v215_v9 }
 0x21a   :  { %v220_v14 = vpop.permute.xlu1 %219 }
 0x21b   :  { %v229_v30 = vmul.f32 %v220_v14, %v2846_v15 }
 0x21e   :  { %v225_v20 = vpop.permute.xlu1 %224 }
 0x21f   :  { %v230_v34 = vmul.f32 %v2841_v13, %v225_v20  ;;  %v2266_v13 = vld [vmem:[%s3531_s1 + $0x28] sm:$0xff] }
 0x220   :  { %v2274_v20 = vld [vmem:[%s3532_s2 + $0x28] sm:$0xff] }
 0x279   :  { %v239_v21 = vpop.permute.xlu0 %238 }
 0x27a   :  { %v252_v22 = vadd.f32 %v239_v21, %v228_v19 }
 0x27c   :  { %v2885_v27 = vmul.f32 %v2881_v24, %v252_v22 }
 0x27d   :  { %v234_v26 = vpop.permute.xlu1 %233 }
 0x27e   :  { %v251_v28 = vadd.f32 %v234_v26, %v227_v25  ;;  %v260_v31 = vmax.f32 %v2885_v27, 0.0  ;;  %v2273_v25 = vld [vmem:[%s3532_s2 + $0x20] sm:$0xff] }
 0x280   :  { %v2888_v29 = vmul.f32 %v2881_v24, %v251_v28 }
 0x282   :  { %v259_v10 = vmax.f32 %v2888_v29, 0.0 }
 0x283   :  { %v244_v32 = vpop.permute.xlu0 %243 }
 0x284   :  { %v253_v33 = vadd.f32 %v244_v32, %v229_v30  ;;  %v2586_v11 = vpack.c.bf16 %v260_v31, %v259_v10 }
 0x286   :  { %2587 = vmatprep.subr.bf16.mxu1 %v2586_v11  ;;  %v2899_v36 = vmul.f32 %v2881_v24, %v253_v33  ;;  %v2275_v33 = vld [vmem:[%s3532_s2 + $0x30] sm:$0xff] }
 0x287   :  { %v249_v35 = vpop.permute.xlu1 %248  ;;  %2589 = vmatpush3.bf16.msra.mxu1 %v2586_v11 }
 0x288   :  { %v254_v15 = vadd.f32 %v249_v35, %v230_v34  ;;  %v261_v38 = vmax.f32 %v2899_v36, 0.0  ;;  %v2276_v35 = vld [vmem:[%s3532_s2 + $0x38] sm:$0xff]  ;;  %v2290_v36 = vld [vmem:[%s3531_s1 + $0x68] sm:$0xff] }
 0x28a   :  { %v2902_v37 = vmul.f32 %v2881_v24, %v254_v15 }
 0x28c   :  { %v262_v39 = vmax.f32 %v2902_v37, 0.0  ;;  %v2291_v37 = vld [vmem:[%s3531_s1 + $0x70] sm:$0xff] }
 0x28e   :  { %v2590_v40 = vpack.c.bf16 %v262_v39, %v261_v38 }
 0x290   :  { %2591 = vmatprep.subr.bf16.mxu1 %v2590_v40 }
 0x291   :  { %2593 = vmatpush3.bf16.msra.mxu1 %v2590_v40 }
 0x294   :  { %2464 = vmatmul.mubr.msk.f32.vlgmr.msra.gmra.mrb[0].mxu1 %vm33_vm0, %v2266_v13 }
 0x295   :  { %2466 = vmatprep.mubr.msk.f32.mxu1 %vm33_vm0, %v2267_v41 }
 0x298   :  { %2467 = vmatmul.mubr.msk.f32.gmra.mrb[2].mxu1 %vm33_vm0, %v2268_v42 }
 0x367   :  { %v2922_v43 = vpop.f32.mrb[0].mxu1 }
 0x368   :  { %367 = vadd.xlane.f32.xlu1 %v2922_v43  ;;  %v2925_v44 = vpop.f32.mrb[1].mxu1  ;;  %v374_v46 = vmul.f32 %v2922_v43, %v2922_v43 }
 0x369   :  { %365 = vadd.xlane.f32.xlu0 %v2925_v44  ;;  %v373_v49 = vmul.f32 %v2925_v44, %v2925_v44 }
 0x36b   :  { %v2928_v45 = vpop.f32.mrb[2].mxu1 }
 0x36c   :  { %371 = vadd.xlane.f32.xlu1 %v2928_v45  ;;  %v376_v47 = vmul.f32 %v2928_v45, %v2928_v45  ;;  %v2935_v48 = vpop.f32.mrb[3].mxu1 }
 0x36d   :  { %379 = vadd.xlane.f32.xlu0 %v374_v46  ;;  %v375_v50 = vmul.f32 %v2935_v48, %v2935_v48 }
 0x370   :  { %383 = vadd.xlane.f32.xlu1 %v376_v47 }
 0x371   :  { %377 = vadd.xlane.f32.xlu0 %v373_v49 }
 0x375   :  { %369 = vadd.xlane.f32.xlu0 %v2935_v48 }
 0x379   :  { %381 = vadd.xlane.f32.xlu0 %v375_v50 }
 0x3f5   :  { %v368_v51 = vpop.xlane.xlu1 %367 }
 0x3f6   :  { %v366_v52 = vpop.xlane.xlu0 %365  ;;  %v386_v53 = vmul.f32 0.0625, %v368_v51 }
 0x3f7   :  { %v385_v57 = vmul.f32 0.0625, %v366_v52 }
 0x3f8   :  { %v394_v56 = vmul.f32 %v386_v53, %v386_v53 }
 0x3f9   :  { %v372_v54 = vpop.xlane.xlu1 %371  ;;  %v393_v0 = vmul.f32 %v385_v57, %v385_v57 }
 0x3fa   :  { %v380_v55 = vpop.xlane.xlu0 %379  ;;  %v388_v59 = vmul.f32 0.0625, %v372_v54  ;;  %v2277_v54 = vld [vmem:[%s3531_s1 + $0x40] sm:$0xff] }
 0x3fb   :  { %v390_v58 = vmul.f32 0.0625, %v380_v55  ;;  %2477 = vmatprep.mubr.msk.f32.mxu0 %vm33_vm0, %v2277_v54 }
 0x3fc   :  { %v396_v3 = vmul.f32 %v388_v59, %v388_v59 }
 0x3fd   :  { %v398_v60 = vsub.f32 %v390_v58, %v394_v56  ;;  %v384_v61 = vpop.xlane.xlu1 %383 }
 0x3fe   :  { %v378_v62 = vpop.xlane.xlu0 %377  ;;  %v392_v4 = vmul.f32 0.0625, %v384_v61 }
 0x3ff   :  { %v407_v1 = vadd.f32 1e-05, %v398_v60  ;;  %v389_v2 = vmul.f32 0.0625, %v378_v62 }
 0x400   :  { %v400_v9 = vsub.f32 %v392_v4, %v396_v3 }
 0x401   :  { %2708 = vrsqrt.f32 %v407_v1  ;;  %v397_v5 = vsub.f32 %v389_v2, %v393_v0 }
 0x402   :  { %v370_v6 = vpop.xlane.xlu0 %369  ;;  %v409_v17 = vadd.f32 1e-05, %v400_v9 }
 0x403   :  { %v406_v7 = vadd.f32 1e-05, %v397_v5  ;;  %v387_v8 = vmul.f32 0.0625, %v370_v6 }
 0x405   :  { %2710 = vrsqrt.f32 %v406_v7  ;;  %v395_v14 = vmul.f32 %v387_v8, %v387_v8 }
 0x406   :  { %v382_v12 = vpop.xlane.xlu0 %381  ;;  %2712 = vrsqrt.f32 %v409_v17 }
 0x407   :  { %v391_v16 = vmul.f32 0.0625, %v382_v12 }
 0x409   :  { %v399_v19 = vsub.f32 %v391_v16, %v395_v14 }
 0x40b   :  { %v2709_v21 = vpop.eup %2708  ;;  %v408_v22 = vadd.f32 1e-05, %v399_v19 }
 0x40c   :  { %v415_v23 = vmul.f32 %v2709_v21, %v2274_v20  ;;  %v2279_v21 = vld [vmem:[%s3531_s1 + $0x50] sm:$0xff] }
 0x40d   :  { %2714 = vrsqrt.f32 %v408_v22 }
 0x40e   :  { %v419_v26 = vmul.f32 %v415_v23, %v386_v53 }
 0x40f   :  { %v2711_v28 = vpop.eup %2710 }
 0x410   :  { %428 = vrot.lane.b32.xlu1 %v419_v26, %s2773_s12  ;;  %v414_v30 = vmul.f32 %v2711_v28, %v2273_v25  ;;  %v2713_v11 = vpop.eup %2712 }
 0x411   :  { %v417_v13 = vmul.f32 %v2713_v11, %v2276_v35 }
 0x412   :  { %v418_v32 = vmul.f32 %v414_v30, %v385_v57 }
 0x413   :  { %v421_v41 = vmul.f32 %v417_v13, %v388_v59 }
 0x414   :  { %426 = vrot.lane.b32.xlu0 %v418_v32, %s2773_s12 }
 0x417   :  { %v2715_v34 = vpop.eup %2714 }
 0x418   :  { %444 = vperm.xlu0 %2666, %v414_v30   ;;  %v416_v15 = vmul.f32 %v2715_v34, %v2275_v33 }
 0x41a   :  { %v420_v40 = vmul.f32 %v416_v15, %v387_v8 }
 0x41c   :  { %430 = vrot.lane.b32.xlu1 %v420_v40, %s2773_s12  ;;  %2668 = vset.pattern.permute.xlu0 %v2774_v63 }
 0x420   :  { %432 = vrot.lane.b32.xlu1 %v421_v41, %s2773_s12 }
 0x424   :  { %449 = vperm.xlu1 %2667, %v415_v23  }
 0x428   :  { %454 = vperm.xlu1 %2667, %v416_v15  }
 0x42c   :  { %459 = vperm.xlu1 %2667, %v417_v13  }
 0x430   :  { %2669 = vset.pattern.permute.xlu1 %v2774_v63 }
 0x482   :  { %v429_v42 = vpop.permute.xlu1 %428 }
 0x483   :  { %v439_v46 = vsub.f32 %v2274_v20, %v429_v42 }
 0x485   :  { %473 = vperm.xlu0 %2668, %v439_v46  }
 0x486   :  { %v427_v47 = vpop.permute.xlu0 %426 }
 0x487   :  { %v438_v49 = vsub.f32 %v2273_v25, %v427_v47 }
 0x489   :  { %468 = vperm.xlu1 %2669, %v438_v49  }
 0x48e   :  { %v431_v50 = vpop.permute.xlu1 %430 }
 0x48f   :  { %v440_v51 = vsub.f32 %v2275_v33, %v431_v50 }
 0x491   :  { %478 = vperm.xlu0 %2668, %v440_v51  }
 0x492   :  { %v433_v52 = vpop.permute.xlu1 %432 }
 0x493   :  { %v441_v53 = vsub.f32 %v2276_v35, %v433_v52 }
 0x495   :  { %483 = vperm.xlu1 %2669, %v441_v53   ;;  %2670 = vset.pattern.permute.xlu0 %v2772_v18 }
 0x497   :  { %v445_v57 = vpop.permute.xlu0 %444 }
 0x498   :  { %v462_v62 = vmul.f32 %v445_v57, %v2925_v44 }
 0x499   :  { %2671 = vset.pattern.permute.xlu1 %v2772_v18 }
 0x4a3   :  { %v450_v55 = vpop.permute.xlu1 %449 }
 0x4a4   :  { %v463_v58 = vmul.f32 %v2922_v43, %v450_v55 }
 0x4a7   :  { %v455_v56 = vpop.permute.xlu1 %454 }
 0x4a8   :  { %v464_v6 = vmul.f32 %v455_v56, %v2935_v48  ;;  %v2278_v48 = vld [vmem:[%s3531_s1 + $0x48] sm:$0xff] }
 0x4ab   :  { %v460_v59 = vpop.permute.xlu1 %459 }
 0x4ac   :  { %v465_v43 = vmul.f32 %v2928_v45, %v460_v59  ;;  %v2280_v45 = vld [vmem:[%s3531_s1 + $0x58] sm:$0xff] }
 0x504   :  { %v474_v60 = vpop.permute.xlu0 %473 }
 0x505   :  { %v487_v61 = vadd.f32 %v474_v60, %v463_v58 }
 0x507   :  { %v491_v1 = vmul.f32 %v2881_v24, %v487_v61 }
 0x508   :  { %v469_v0 = vpop.permute.xlu1 %468 }
 0x509   :  { %v486_v2 = vadd.f32 %v469_v0, %v462_v62  ;;  %v495_v4 = vmax.f32 %v491_v1, 0.0 }
 0x50b   :  { %v490_v3 = vmul.f32 %v2881_v24, %v486_v2 }
 0x50d   :  { %v494_v5 = vmax.f32 %v490_v3, 0.0  ;;  %v2286_v3 = vld [vmem:[%s3532_s2 + $0x48] sm:$0xff] }
 0x50f   :  { %v2594_v7 = vpack.c.bf16 %v495_v4, %v494_v5 }
 0x510   :  { %v479_v8 = vpop.permute.xlu0 %478 }
 0x511   :  { %v488_v9 = vadd.f32 %v479_v8, %v464_v6  ;;  %2595 = vmatprep.subr.bf16.mxu0 %v2594_v7 }
 0x512   :  { %2597 = vmatpush3.bf16.msra.mxu0 %v2594_v7  ;;  %v2285_v7 = vld [vmem:[%s3532_s2 + $0x40] sm:$0xff] }
 0x513   :  { %v492_v44 = vmul.f32 %v2881_v24, %v488_v9 }
 0x514   :  { %v484_v12 = vpop.permute.xlu1 %483 }
 0x515   :  { %v489_v14 = vadd.f32 %v484_v12, %v465_v43  ;;  %v496_v17 = vmax.f32 %v492_v44, 0.0  ;;  %v2287_v44 = vld [vmem:[%s3532_s2 + $0x50] sm:$0xff] }
 0x517   :  { %v493_v16 = vmul.f32 %v2881_v24, %v489_v14 }
 0x519   :  { %v497_v19 = vmax.f32 %v493_v16, 0.0 }
 0x51b   :  { %v2598_v20 = vpack.c.bf16 %v497_v19, %v496_v17  ;;  %v2288_v17 = vld [vmem:[%s3532_s2 + $0x58] sm:$0xff] }
 0x51d   :  { %2599 = vmatprep.subr.bf16.mxu0 %v2598_v20 }
 0x51e   :  { %2601 = vmatpush3.bf16.msra.mxu0 %v2598_v20 }
 0x521   :  { %2478 = vmatmul.mubr.msk.f32.vlgmr.msra.gmra.mrb[4].mxu0 %vm33_vm0, %v2278_v48 }
 0x522   :  { %2480 = vmatprep.mubr.msk.f32.mxu0 %vm33_vm0, %v2279_v21 }
 0x525   :  { %2481 = vmatmul.mubr.msk.f32.gmra.mrb[6].mxu0 %vm33_vm0, %v2280_v45 }
 0x5f4   :  { %v2986_v22 = vpop.f32.mrb[4].mxu0 }
 0x5f5   :  { %602 = vadd.xlane.f32.xlu1 %v2986_v22  ;;  %v2989_v23 = vpop.f32.mrb[5].mxu0  ;;  %v609_v26 = vmul.f32 %v2986_v22, %v2986_v22 }
 0x5f6   :  { %600 = vadd.xlane.f32.xlu0 %v2989_v23  ;;  %v608_v32 = vmul.f32 %v2989_v23, %v2989_v23 }
 0x5f8   :  { %v2992_v25 = vpop.f32.mrb[6].mxu0 }
 0x5f9   :  { %606 = vadd.xlane.f32.xlu1 %v2992_v25  ;;  %v611_v28 = vmul.f32 %v2992_v25, %v2992_v25  ;;  %v2999_v30 = vpop.f32.mrb[7].mxu0 }
 0x5fa   :  { %614 = vadd.xlane.f32.xlu0 %v609_v26  ;;  %v610_v33 = vmul.f32 %v2999_v30, %v2999_v30 }
 0x5fd   :  { %618 = vadd.xlane.f32.xlu1 %v611_v28 }
 0x5fe   :  { %612 = vadd.xlane.f32.xlu0 %v608_v32 }
 0x602   :  { %604 = vadd.xlane.f32.xlu0 %v2999_v30 }
 0x606   :  { %616 = vadd.xlane.f32.xlu0 %v610_v33 }
 0x682   :  { %v603_v11 = vpop.xlane.xlu1 %602 }
 0x683   :  { %v601_v34 = vpop.xlane.xlu0 %600  ;;  %v621_v35 = vmul.f32 0.0625, %v603_v11 }
 0x684   :  { %v620_v41 = vmul.f32 0.0625, %v601_v34 }
 0x685   :  { %v629_v13 = vmul.f32 %v621_v35, %v621_v35 }
 0x686   :  { %v607_v15 = vpop.xlane.xlu1 %606  ;;  %v628_v51 = vmul.f32 %v620_v41, %v620_v41 }
 0x687   :  { %v615_v40 = vpop.xlane.xlu0 %614  ;;  %v623_v46 = vmul.f32 0.0625, %v607_v15  ;;  %v2289_v15 = vld [vmem:[%s3531_s1 + $0x60] sm:$0xff] }
 0x688   :  { %v625_v42 = vmul.f32 0.0625, %v615_v40  ;;  %2491 = vmatprep.mubr.msk.f32.mxu1 %vm33_vm0, %v2289_v15 }
 0x689   :  { %v631_v54 = vmul.f32 %v623_v46, %v623_v46 }
 0x68a   :  { %v633_v47 = vsub.f32 %v625_v42, %v629_v13  ;;  %v619_v49 = vpop.xlane.xlu1 %618 }
 0x68b   :  { %v613_v50 = vpop.xlane.xlu0 %612  ;;  %v627_v55 = vmul.f32 0.0625, %v619_v49 }
 0x68c   :  { %v642_v52 = vadd.f32 1e-05, %v633_v47  ;;  %v624_v53 = vmul.f32 0.0625, %v613_v50 }
 0x68d   :  { %v635_v60 = vsub.f32 %v627_v55, %v631_v54 }
 0x68e   :  { %2716 = vrsqrt.f32 %v642_v52  ;;  %v632_v56 = vsub.f32 %v624_v53, %v628_v51 }
 0x68f   :  { %v605_v57 = vpop.xlane.xlu0 %604  ;;  %v644_v1 = vadd.f32 1e-05, %v635_v60 }
 0x690   :  { %v641_v58 = vadd.f32 1e-05, %v632_v56  ;;  %v622_v59 = vmul.f32 0.0625, %v605_v57 }
 0x692   :  { %2718 = vrsqrt.f32 %v641_v58  ;;  %v630_v62 = vmul.f32 %v622_v59, %v622_v59 }
 0x693   :  { %v617_v61 = vpop.xlane.xlu0 %616  ;;  %2720 = vrsqrt.f32 %v644_v1 }
 0x694   :  { %v626_v0 = vmul.f32 0.0625, %v617_v61 }
 0x696   :  { %v634_v2 = vsub.f32 %v626_v0, %v630_v62 }
 0x698   :  { %v2717_v4 = vpop.eup %2716  ;;  %v643_v5 = vadd.f32 1e-05, %v634_v2 }
 0x699   :  { %v650_v6 = vmul.f32 %v2717_v4, %v2286_v3 }
 0x69a   :  { %2722 = vrsqrt.f32 %v643_v5 }
 0x69b   :  { %v654_v8 = vmul.f32 %v650_v6, %v621_v35 }
 0x69c   :  { %v2719_v9 = vpop.eup %2718 }
 0x69d   :  { %663 = vrot.lane.b32.xlu1 %v654_v8, %s2773_s12  ;;  %v649_v43 = vmul.f32 %v2719_v9, %v2285_v7  ;;  %v2721_v14 = vpop.eup %2720 }
 0x69e   :  { %v652_v48 = vmul.f32 %v2721_v14, %v2288_v17 }
 0x69f   :  { %v653_v12 = vmul.f32 %v649_v43, %v620_v41 }
 0x6a0   :  { %v656_v21 = vmul.f32 %v652_v48, %v623_v46 }
 0x6a1   :  { %661 = vrot.lane.b32.xlu0 %v653_v12, %s2773_s12 }
 0x6a4   :  { %v2723_v16 = vpop.eup %2722 }
 0x6a5   :  { %679 = vperm.xlu0 %2670, %v649_v43   ;;  %v651_v19 = vmul.f32 %v2723_v16, %v2287_v44 }
 0x6a7   :  { %v655_v20 = vmul.f32 %v651_v19, %v622_v59 }
 0x6a9   :  { %665 = vrot.lane.b32.xlu1 %v655_v20, %s2773_s12  ;;  %2672 = vset.pattern.permute.xlu0 %v2774_v63 }
 0x6ad   :  { %667 = vrot.lane.b32.xlu1 %v656_v21, %s2773_s12 }
 0x6b1   :  { %684 = vperm.xlu1 %2671, %v650_v6  }
 0x6b5   :  { %689 = vperm.xlu1 %2671, %v651_v19  }
 0x6b9   :  { %694 = vperm.xlu1 %2671, %v652_v48  }
 0x6bd   :  { %2673 = vset.pattern.permute.xlu1 %v2774_v63 }
 0x70f   :  { %v664_v45 = vpop.permute.xlu1 %663 }
 0x710   :  { %v674_v26 = vsub.f32 %v2286_v3, %v664_v45 }
 0x712   :  { %708 = vperm.xlu0 %2672, %v674_v26  }
 0x713   :  { %v662_v28 = vpop.permute.xlu0 %661 }
 0x714   :  { %v673_v32 = vsub.f32 %v2285_v7, %v662_v28 }
 0x716   :  { %703 = vperm.xlu1 %2673, %v673_v32  }
 0x71b   :  { %v666_v33 = vpop.permute.xlu1 %665 }
 0x71c   :  { %v675_v11 = vsub.f32 %v2287_v44, %v666_v33 }
 0x71e   :  { %713 = vperm.xlu0 %2672, %v675_v11  }
 0x71f   :  { %v668_v34 = vpop.permute.xlu1 %667 }
 0x720   :  { %v676_v35 = vsub.f32 %v2288_v17, %v668_v34 }
 0x722   :  { %718 = vperm.xlu1 %2673, %v676_v35   ;;  %2674 = vset.pattern.permute.xlu0 %v2772_v18 }
 0x724   :  { %v680_v41 = vpop.permute.xlu0 %679 }
 0x725   :  { %v697_v50 = vmul.f32 %v680_v41, %v2989_v23 }
 0x726   :  { %2675 = vset.pattern.permute.xlu1 %v2772_v18 }
 0x730   :  { %v685_v40 = vpop.permute.xlu1 %684 }
 0x731   :  { %v698_v42 = vmul.f32 %v2986_v22, %v685_v40 }
 0x734   :  { %v690_v13 = vpop.permute.xlu1 %689 }
 0x735   :  { %v699_v22 = vmul.f32 %v690_v13, %v2999_v30 }
 0x738   :  { %v695_v46 = vpop.permute.xlu1 %694 }
 0x791   :  { %v709_v47 = vpop.permute.xlu0 %708 }
 0x792   :  { %v722_v49 = vadd.f32 %v709_v47, %v698_v42 }
 0x794   :  { %v726_v51 = vmul.f32 %v2881_v24, %v722_v49 }
 0x795   :  { %v704_v52 = vpop.permute.xlu1 %703 }
 0x796   :  { %v721_v53 = vadd.f32 %v704_v52, %v697_v50  ;;  %v3035_v54 = vadd.f32 %v726_v51, %v260_v31  ;;  %v700_v31 = vmul.f32 %v2992_v25, %v695_v46  ;;  %v2298_v50 = vld [vmem:[%s3532_s2 + $0x68] sm:$0xff] }
 0x798   :  { %v725_v55 = vmul.f32 %v2881_v24, %v721_v53  ;;  %v734_v23 = vmax.f32 %v3035_v54, 0.0 }
 0x79a   :  { %v3040_v56 = vadd.f32 %v725_v55, %v259_v10  ;;  %v2297_v55 = vld [vmem:[%s3532_s2 + $0x60] sm:$0xff] }
 0x79c   :  { %v733_v57 = vmax.f32 %v3040_v56, 0.0 }
 0x79d   :  { %v714_v58 = vpop.permute.xlu0 %713 }
 0x79e   :  { %v723_v59 = vadd.f32 %v714_v58, %v699_v22  ;;  %v2602_v27 = vpack.c.bf16 %v734_v23, %v733_v57 }
 0x7a0   :  { %v727_v60 = vmul.f32 %v2881_v24, %v723_v59  ;;  %2603 = vmatprep.subr.bf16.mxu1 %v2602_v27 }
 0x7a1   :  { %v719_v29 = vpop.permute.xlu1 %718  ;;  %2605 = vmatpush3.bf16.msra.mxu1 %v2602_v27 }
 0x7a2   :  { %v724_v10 = vadd.f32 %v719_v29, %v700_v31  ;;  %v3053_v30 = vadd.f32 %v727_v60, %v261_v38  ;;  %v2292_v38 = vld [vmem:[%s3531_s1 + $0x78] sm:$0xff]  ;;  %v2299_v31 = vld [vmem:[%s3532_s2 + $0x70] sm:$0xff] }
 0x7a4   :  { %v728_v61 = vmul.f32 %v2881_v24, %v724_v10  ;;  %v735_v0 = vmax.f32 %v3053_v30, 0.0  ;;  %v2300_v10 = vld [vmem:[%s3532_s2 + $0x78] sm:$0xff]  ;;  %v2314_v30 = vld [vmem:[%s3531_s1 + $0xa8] sm:$0xff] }
 0x7a6   :  { %v3058_v62 = vadd.f32 %v728_v61, %v262_v39 }
 0x7a8   :  { %v736_v25 = vmax.f32 %v3058_v62, 0.0  ;;  %v2315_v62 = vld [vmem:[%s3531_s1 + $0xb0] sm:$0xff] }
 0x7aa   :  { %v2606_v1 = vpack.c.bf16 %v736_v25, %v735_v0 }
 0x7ac   :  { %2607 = vmatprep.subr.bf16.mxu1 %v2606_v1 }
 0x7ad   :  { %2609 = vmatpush3.bf16.msra.mxu1 %v2606_v1 }
 0x7b0   :  { %2492 = vmatmul.mubr.msk.f32.vlgmr.msra.gmra.mrb[4].mxu1 %vm33_vm0, %v2290_v36 }
 0x7b1   :  { %2494 = vmatprep.mubr.msk.f32.mxu1 %vm33_vm0, %v2291_v37 }
 0x7b4   :  { %2495 = vmatmul.mubr.msk.f32.gmra.mrb[6].mxu1 %vm33_vm0, %v2292_v38 }
 0x883   :  { %v3078_v39 = vpop.f32.mrb[4].mxu1 }
 0x884   :  { %841 = vadd.xlane.f32.xlu1 %v3078_v39  ;;  %v3081_v2 = vpop.f32.mrb[5].mxu1  ;;  %v848_v4 = vmul.f32 %v3078_v39, %v3078_v39 }
 0x885   :  { %839 = vadd.xlane.f32.xlu0 %v3081_v2  ;;  %v847_v7 = vmul.f32 %v3081_v2, %v3081_v2 }
 0x887   :  { %v3084_v3 = vpop.f32.mrb[6].mxu1 }
 0x888   :  { %845 = vadd.xlane.f32.xlu1 %v3084_v3  ;;  %v850_v5 = vmul.f32 %v3084_v3, %v3084_v3  ;;  %v3091_v6 = vpop.f32.mrb[7].mxu1 }
 0x889   :  { %853 = vadd.xlane.f32.xlu0 %v848_v4  ;;  %v849_v8 = vmul.f32 %v3091_v6, %v3091_v6 }
 0x88c   :  { %857 = vadd.xlane.f32.xlu1 %v850_v5 }
 0x88d   :  { %851 = vadd.xlane.f32.xlu0 %v847_v7 }
 0x891   :  { %843 = vadd.xlane.f32.xlu0 %v3091_v6 }
 0x895   :  { %855 = vadd.xlane.f32.xlu0 %v849_v8 }
 0x911   :  { %v842_v9 = vpop.xlane.xlu1 %841 }
 0x912   :  { %v840_v43 = vpop.xlane.xlu0 %839  ;;  %v860_v12 = vmul.f32 0.0625, %v842_v9 }
 0x913   :  { %v859_v17 = vmul.f32 0.0625, %v840_v43 }
 0x914   :  { %v868_v16 = vmul.f32 %v860_v12, %v860_v12 }
 0x915   :  { %v846_v44 = vpop.xlane.xlu1 %845  ;;  %v867_v26 = vmul.f32 %v859_v17, %v859_v17 }
 0x916   :  { %v854_v14 = vpop.xlane.xlu0 %853  ;;  %v862_v20 = vmul.f32 0.0625, %v846_v44  ;;  %v2301_v44 = vld [vmem:[%s3531_s1 + $0x80] sm:$0xff] }
 0x917   :  { %v864_v19 = vmul.f32 0.0625, %v854_v14  ;;  %2505 = vmatprep.mubr.msk.f32.mxu0 %vm33_vm0, %v2301_v44 }
 0x918   :  { %v870_v33 = vmul.f32 %v862_v20, %v862_v20 }
 0x919   :  { %v872_v48 = vsub.f32 %v864_v19, %v868_v16  ;;  %v858_v21 = vpop.xlane.xlu1 %857 }
 0x91a   :  { %v852_v45 = vpop.xlane.xlu0 %851  ;;  %v866_v11 = vmul.f32 0.0625, %v858_v21 }
 0x91b   :  { %v881_v28 = vadd.f32 1e-05, %v872_v48  ;;  %v863_v32 = vmul.f32 0.0625, %v852_v45 }
 0x91c   :  { %v874_v13 = vsub.f32 %v866_v11, %v870_v33 }
 0x91d   :  { %2724 = vrsqrt.f32 %v881_v28  ;;  %v871_v34 = vsub.f32 %v863_v32, %v867_v26 }
 0x91e   :  { %v844_v35 = vpop.xlane.xlu0 %843  ;;  %v883_v47 = vadd.f32 1e-05, %v874_v13 }
 0x91f   :  { %v880_v15 = vadd.f32 1e-05, %v871_v34  ;;  %v861_v40 = vmul.f32 0.0625, %v844_v35 }
 0x921   :  { %2726 = vrsqrt.f32 %v880_v15  ;;  %v869_v42 = vmul.f32 %v861_v40, %v861_v40 }
 0x922   :  { %v856_v41 = vpop.xlane.xlu0 %855  ;;  %2728 = vrsqrt.f32 %v883_v47 }
 0x923   :  { %v865_v46 = vmul.f32 0.0625, %v856_v41 }
 0x925   :  { %v873_v49 = vsub.f32 %v865_v46, %v869_v42 }
 0x927   :  { %v2725_v51 = vpop.eup %2724  ;;  %v882_v52 = vadd.f32 1e-05, %v873_v49 }
 0x928   :  { %v889_v53 = vmul.f32 %v2725_v51, %v2298_v50  ;;  %v2303_v51 = vld [vmem:[%s3531_s1 + $0x90] sm:$0xff] }
 0x929   :  { %2730 = vrsqrt.f32 %v882_v52 }
 0x92a   :  { %v893_v22 = vmul.f32 %v889_v53, %v860_v12 }
 0x92b   :  { %v2727_v58 = vpop.eup %2726 }
 0x92c   :  { %902 = vrot.lane.b32.xlu1 %v893_v22, %s2773_s12  ;;  %v888_v59 = vmul.f32 %v2727_v58, %v2297_v55  ;;  %v2729_v60 = vpop.eup %2728 }
 0x92d   :  { %v891_v36 = vmul.f32 %v2729_v60, %v2300_v10 }
 0x92e   :  { %v892_v27 = vmul.f32 %v888_v59, %v859_v17 }
 0x92f   :  { %v895_v37 = vmul.f32 %v891_v36, %v862_v20 }
 0x930   :  { %900 = vrot.lane.b32.xlu0 %v892_v27, %s2773_s12 }
 0x933   :  { %v2731_v29 = vpop.eup %2730 }
 0x934   :  { %918 = vperm.xlu0 %2674, %v888_v59   ;;  %v890_v61 = vmul.f32 %v2731_v29, %v2299_v31 }
 0x936   :  { %v894_v1 = vmul.f32 %v890_v61, %v861_v40 }
 0x938   :  { %904 = vrot.lane.b32.xlu1 %v894_v1, %s2773_s12  ;;  %2676 = vset.pattern.permute.xlu0 %v2774_v63 }
 0x93c   :  { %906 = vrot.lane.b32.xlu1 %v895_v37, %s2773_s12 }
 0x940   :  { %923 = vperm.xlu1 %2675, %v889_v53  }
 0x944   :  { %928 = vperm.xlu1 %2675, %v890_v61  }
 0x948   :  { %933 = vperm.xlu1 %2675, %v891_v36  }
 0x94c   :  { %2677 = vset.pattern.permute.xlu1 %v2774_v63 }
 0x99e   :  { %v903_v38 = vpop.permute.xlu1 %902 }
 0x99f   :  { %v913_v4 = vsub.f32 %v2298_v50, %v903_v38 }
 0x9a1   :  { %947 = vperm.xlu0 %2676, %v913_v4  }
 0x9a2   :  { %v901_v5 = vpop.permute.xlu0 %900 }
 0x9a3   :  { %v912_v7 = vsub.f32 %v2297_v55, %v901_v5 }
 0x9a5   :  { %942 = vperm.xlu1 %2677, %v912_v7  }
 0x9aa   :  { %v905_v8 = vpop.permute.xlu1 %904 }
 0x9ab   :  { %v914_v9 = vsub.f32 %v2299_v31, %v905_v8 }
 0x9ad   :  { %952 = vperm.xlu0 %2676, %v914_v9  }
 0x9ae   :  { %v907_v43 = vpop.permute.xlu1 %906 }
 0x9af   :  { %v915_v12 = vsub.f32 %v2300_v10, %v907_v43 }
 0x9b1   :  { %957 = vperm.xlu1 %2677, %v915_v12   ;;  %2678 = vset.pattern.permute.xlu0 %v2772_v18 }
 0x9b3   :  { %v919_v17 = vpop.permute.xlu0 %918 }
 0x9b4   :  { %v936_v45 = vmul.f32 %v919_v17, %v3081_v2 }
 0x9b5   :  { %2679 = vset.pattern.permute.xlu1 %v2772_v18 }
 0x9bf   :  { %v924_v14 = vpop.permute.xlu1 %923 }
 0x9c0   :  { %v937_v19 = vmul.f32 %v3078_v39, %v924_v14 }
 0x9c3   :  { %v929_v16 = vpop.permute.xlu1 %928 }
 0x9c4   :  { %v938_v35 = vmul.f32 %v929_v16, %v3091_v6  ;;  %v2302_v6 = vld [vmem:[%s3531_s1 + $0x88] sm:$0xff] }
 0x9c7   :  { %v934_v20 = vpop.permute.xlu1 %933 }
 0x9c8   :  { %v939_v39 = vmul.f32 %v3084_v3, %v934_v20  ;;  %v2304_v3 = vld [vmem:[%s3531_s1 + $0x98] sm:$0xff] }
 0xa20   :  { %v948_v48 = vpop.permute.xlu0 %947 }
 0xa21   :  { %v961_v21 = vadd.f32 %v948_v48, %v937_v19 }
 0xa23   :  { %v965_v28 = vmul.f32 %v2881_v24, %v961_v21 }
 0xa24   :  { %v943_v26 = vpop.permute.xlu1 %942 }
 0xa25   :  { %v960_v32 = vadd.f32 %v943_v26, %v936_v45  ;;  %v969_v11 = vmax.f32 %v965_v28, 0.0 }
 0xa27   :  { %v964_v33 = vmul.f32 %v2881_v24, %v960_v32 }
 0xa29   :  { %v968_v34 = vmax.f32 %v964_v33, 0.0  ;;  %v2310_v33 = vld [vmem:[%s3532_s2 + $0x88] sm:$0xff] }
 0xa2b   :  { %v2610_v15 = vpack.c.bf16 %v969_v11, %v968_v34 }
 0xa2c   :  { %v953_v40 = vpop.permute.xlu0 %952 }
 0xa2d   :  { %v962_v13 = vadd.f32 %v953_v40, %v938_v35  ;;  %2611 = vmatprep.subr.bf16.mxu0 %v2610_v15 }
 0xa2e   :  { %2613 = vmatpush3.bf16.msra.mxu0 %v2610_v15  ;;  %v2309_v15 = vld [vmem:[%s3532_s2 + $0x80] sm:$0xff] }
 0xa2f   :  { %v966_v2 = vmul.f32 %v2881_v24, %v962_v13 }
 0xa30   :  { %v958_v41 = vpop.permute.xlu1 %957 }
 0xa31   :  { %v963_v42 = vadd.f32 %v958_v41, %v939_v39  ;;  %v970_v47 = vmax.f32 %v966_v2, 0.0  ;;  %v2311_v2 = vld [vmem:[%s3532_s2 + $0x90] sm:$0xff] }
 0xa33   :  { %v967_v46 = vmul.f32 %v2881_v24, %v963_v42 }
 0xa35   :  { %v971_v49 = vmax.f32 %v967_v46, 0.0 }
 0xa37   :  { %v2614_v50 = vpack.c.bf16 %v971_v49, %v970_v47  ;;  %v2312_v47 = vld [vmem:[%s3532_s2 + $0x98] sm:$0xff] }
 0xa39   :  { %2615 = vmatprep.subr.bf16.mxu0 %v2614_v50 }
 0xa3a   :  { %2617 = vmatpush3.bf16.msra.mxu0 %v2614_v50 }
 0xa3d   :  { %2506 = vmatmul.mubr.msk.f32.vlgmr.msra.gmra.mrb[8].mxu0 %vm33_vm0, %v2302_v6 }
 0xa3e   :  { %2508 = vmatprep.mubr.msk.f32.mxu0 %vm33_vm0, %v2303_v51 }
 0xa41   :  { %2509 = vmatmul.mubr.msk.f32.gmra.mrb[10].mxu0 %vm33_vm0, %v2304_v3 }
 0xb10   :  { %v3142_v52 = vpop.f32.mrb[8].mxu0 }
 0xb11   :  { %1076 = vadd.xlane.f32.xlu1 %v3142_v52  ;;  %v3145_v53 = vpop.f32.mrb[9].mxu0  ;;  %v1083_v22 = vmul.f32 %v3142_v52, %v3142_v52 }
 0xb12   :  { %1074 = vadd.xlane.f32.xlu0 %v3145_v53  ;;  %v1082_v27 = vmul.f32 %v3145_v53, %v3145_v53 }
 0xb14   :  { %v3148_v55 = vpop.f32.mrb[10].mxu0 }
 0xb15   :  { %1080 = vadd.xlane.f32.xlu1 %v3148_v55  ;;  %v1085_v58 = vmul.f32 %v3148_v55, %v3148_v55  ;;  %v3155_v59 = vpop.f32.mrb[11].mxu0 }
 0xb16   :  { %1088 = vadd.xlane.f32.xlu0 %v1083_v22  ;;  %v1084_v31 = vmul.f32 %v3155_v59, %v3155_v59 }
 0xb19   :  { %1092 = vadd.xlane.f32.xlu1 %v1085_v58 }
 0xb1a   :  { %1086 = vadd.xlane.f32.xlu0 %v1082_v27 }
 0xb1e   :  { %1078 = vadd.xlane.f32.xlu0 %v3155_v59 }
 0xb22   :  { %1090 = vadd.xlane.f32.xlu0 %v1084_v31 }
 0xb9e   :  { %v1077_v60 = vpop.xlane.xlu1 %1076 }
 0xb9f   :  { %v1075_v29 = vpop.xlane.xlu0 %1074  ;;  %v1095_v10 = vmul.f32 0.0625, %v1077_v60 }
 0xba0   :  { %v1094_v37 = vmul.f32 0.0625, %v1075_v29 }
 0xba1   :  { %v1103_v36 = vmul.f32 %v1095_v10, %v1095_v10 }
 0xba2   :  { %v1081_v61 = vpop.xlane.xlu1 %1080  ;;  %v1102_v9 = vmul.f32 %v1094_v37, %v1094_v37 }
 0xba3   :  { %v1089_v1 = vpop.xlane.xlu0 %1088  ;;  %v1097_v4 = vmul.f32 0.0625, %v1081_v61  ;;  %v2313_v61 = vld [vmem:[%s3531_s1 + $0xa0] sm:$0xff] }
 0xba4   :  { %v1099_v38 = vmul.f32 0.0625, %v1089_v1  ;;  %2519 = vmatprep.mubr.msk.f32.mxu1 %vm33_vm0, %v2313_v61 }
 0xba5   :  { %v1105_v44 = vmul.f32 %v1097_v4, %v1097_v4 }
 0xba6   :  { %v1107_v5 = vsub.f32 %v1099_v38, %v1103_v36  ;;  %v1093_v7 = vpop.xlane.xlu1 %1092 }
 0xba7   :  { %v1087_v8 = vpop.xlane.xlu0 %1086  ;;  %v1101_v14 = vmul.f32 0.0625, %v1093_v7 }
 0xba8   :  { %v1116_v43 = vadd.f32 1e-05, %v1107_v5  ;;  %v1098_v12 = vmul.f32 0.0625, %v1087_v8 }
 0xba9   :  { %v1109_v48 = vsub.f32 %v1101_v14, %v1105_v44 }
 0xbaa   :  { %2732 = vrsqrt.f32 %v1116_v43  ;;  %v1106_v16 = vsub.f32 %v1098_v12, %v1102_v9 }
 0xbab   :  { %v1079_v17 = vpop.xlane.xlu0 %1078  ;;  %v1118_v28 = vadd.f32 1e-05, %v1109_v48 }
 0xbac   :  { %v1115_v19 = vadd.f32 1e-05, %v1106_v16  ;;  %v1096_v20 = vmul.f32 0.0625, %v1079_v17 }
 0xbae   :  { %2734 = vrsqrt.f32 %v1115_v19  ;;  %v1104_v45 = vmul.f32 %v1096_v20, %v1096_v20 }
 0xbaf   :  { %v1091_v21 = vpop.xlane.xlu0 %1090  ;;  %2736 = vrsqrt.f32 %v1118_v28 }
 0xbb0   :  { %v1100_v26 = vmul.f32 0.0625, %v1091_v21 }
 0xbb2   :  { %v1108_v32 = vsub.f32 %v1100_v26, %v1104_v45 }
 0xbb4   :  { %v2733_v11 = vpop.eup %2732  ;;  %v1117_v34 = vadd.f32 1e-05, %v1108_v32 }
 0xbb5   :  { %v1124_v35 = vmul.f32 %v2733_v11, %v2310_v33 }
 0xbb6   :  { %2738 = vrsqrt.f32 %v1117_v34 }
 0xbb7   :  { %v1128_v40 = vmul.f32 %v1124_v35, %v1095_v10 }
 0xbb8   :  { %v2735_v13 = vpop.eup %2734 }
 0xbb9   :  { %1137 = vrot.lane.b32.xlu1 %v1128_v40, %s2773_s12  ;;  %v1123_v39 = vmul.f32 %v2735_v13, %v2309_v15  ;;  %v2737_v42 = vpop.eup %2736 }
 0xbba   :  { %v1126_v6 = vmul.f32 %v2737_v42, %v2312_v47 }
 0xbbb   :  { %v1127_v41 = vmul.f32 %v1123_v39, %v1094_v37 }
 0xbbc   :  { %v1130_v51 = vmul.f32 %v1126_v6, %v1097_v4 }
 0xbbd   :  { %1135 = vrot.lane.b32.xlu0 %v1127_v41, %s2773_s12 }
 0xbc0   :  { %v2739_v46 = vpop.eup %2738 }
 0xbc1   :  { %1153 = vperm.xlu0 %2678, %v1123_v39   ;;  %v1125_v49 = vmul.f32 %v2739_v46, %v2311_v2 }
 0xbc3   :  { %v1129_v50 = vmul.f32 %v1125_v49, %v1096_v20 }
 0xbc5   :  { %1139 = vrot.lane.b32.xlu1 %v1129_v50, %s2773_s12  ;;  %2680 = vset.pattern.permute.xlu0 %v2774_v63 }
 0xbc9   :  { %1141 = vrot.lane.b32.xlu1 %v1130_v51, %s2773_s12 }
 0xbcd   :  { %1158 = vperm.xlu1 %2679, %v1124_v35  }
 0xbd1   :  { %1163 = vperm.xlu1 %2679, %v1125_v49  }
 0xbd5   :  { %1168 = vperm.xlu1 %2679, %v1126_v6  }
 0xbd9   :  { %2681 = vset.pattern.permute.xlu1 %v2774_v63 }
 0xc2b   :  { %v1138_v3 = vpop.permute.xlu1 %1137 }
 0xc2c   :  { %v1148_v22 = vsub.f32 %v2310_v33, %v1138_v3 }
 0xc2e   :  { %1182 = vperm.xlu0 %2680, %v1148_v22  }
 0xc2f   :  { %v1136_v58 = vpop.permute.xlu0 %1135 }
 0xc30   :  { %v1147_v27 = vsub.f32 %v2309_v15, %v1136_v58 }
 0xc32   :  { %1177 = vperm.xlu1 %2681, %v1147_v27  }
 0xc37   :  { %v1140_v31 = vpop.permute.xlu1 %1139 }
 0xc38   :  { %v1149_v60 = vsub.f32 %v2311_v2, %v1140_v31 }
 0xc3a   :  { %1187 = vperm.xlu0 %2680, %v1149_v60  }
 0xc3b   :  { %v1142_v29 = vpop.permute.xlu1 %1141 }
 0xc3c   :  { %v1150_v10 = vsub.f32 %v2312_v47, %v1142_v29 }
 0xc3e   :  { %1192 = vperm.xlu1 %2681, %v1150_v10   ;;  %2682 = vset.pattern.permute.xlu0 %v2772_v18 }
 0xc40   :  { %v1154_v37 = vpop.permute.xlu0 %1153 }
 0xc41   :  { %v1171_v8 = vmul.f32 %v1154_v37, %v3145_v53 }
 0xc42   :  { %2683 = vset.pattern.permute.xlu1 %v2772_v18 }
 0xc4c   :  { %v1159_v1 = vpop.permute.xlu1 %1158 }
 0xc4d   :  { %v1172_v38 = vmul.f32 %v3142_v52, %v1159_v1 }
 0xc50   :  { %v1164_v36 = vpop.permute.xlu1 %1163 }
 0xc51   :  { %v1173_v52 = vmul.f32 %v1164_v36, %v3155_v59 }
 0xc54   :  { %v1169_v4 = vpop.permute.xlu1 %1168 }
 0xcad   :  { %v1183_v5 = vpop.permute.xlu0 %1182 }
 0xcae   :  { %v1196_v7 = vadd.f32 %v1183_v5, %v1172_v38 }
 0xcb0   :  { %v1200_v9 = vmul.f32 %v2881_v24, %v1196_v7 }
 0xcb1   :  { %v1178_v43 = vpop.permute.xlu1 %1177 }
 0xcb2   :  { %v1195_v12 = vadd.f32 %v1178_v43, %v1171_v8  ;;  %v3191_v44 = vadd.f32 %v1200_v9, %v734_v23  ;;  %v1174_v23 = vmul.f32 %v3148_v55, %v1169_v4  ;;  %v2322_v8 = vld [vmem:[%s3532_s2 + $0xa8] sm:$0xff] }
 0xcb4   :  { %v1199_v14 = vmul.f32 %v2881_v24, %v1195_v12  ;;  %v1208_v17 = vmax.f32 %v3191_v44, 0.0 }
 0xcb6   :  { %v3196_v16 = vadd.f32 %v1199_v14, %v733_v57  ;;  %v2321_v14 = vld [vmem:[%s3532_s2 + $0xa0] sm:$0xff] }
 0xcb8   :  { %v1207_v53 = vmax.f32 %v3196_v16, 0.0 }
 0xcb9   :  { %v1188_v19 = vpop.permute.xlu0 %1187 }
 0xcba   :  { %v1197_v20 = vadd.f32 %v1188_v19, %v1173_v52  ;;  %v2618_v54 = vpack.c.bf16 %v1208_v17, %v1207_v53 }
 0xcbc   :  { %v1201_v48 = vmul.f32 %v2881_v24, %v1197_v20  ;;  %2619 = vmatprep.subr.bf16.mxu1 %v2618_v54 }
 0xcbd   :  { %v1193_v56 = vpop.permute.xlu1 %1192  ;;  %2621 = vmatpush3.bf16.msra.mxu1 %v2618_v54 }
 0xcbe   :  { %v1198_v57 = vadd.f32 %v1193_v56, %v1174_v23  ;;  %v3209_v59 = vadd.f32 %v1201_v48, %v735_v0  ;;  %v2316_v0 = vld [vmem:[%s3531_s1 + $0xb8] sm:$0xff]  ;;  %v2323_v23 = vld [vmem:[%s3532_s2 + $0xb0] sm:$0xff] }
 0xcc0   :  { %v1202_v21 = vmul.f32 %v2881_v24, %v1198_v57  ;;  %v1209_v26 = vmax.f32 %v3209_v59, 0.0  ;;  %v2324_v57 = vld [vmem:[%s3532_s2 + $0xb8] sm:$0xff]  ;;  %v2338_v59 = vld [vmem:[%s3531_s1 + $0xe8] sm:$0xff] }
 0xcc2   :  { %v3214_v45 = vadd.f32 %v1202_v21, %v736_v25 }
 0xcc4   :  { %v1210_v55 = vmax.f32 %v3214_v45, 0.0  ;;  %v2339_v45 = vld [vmem:[%s3531_s1 + $0xf0] sm:$0xff] }
 0xcc6   :  { %v2622_v28 = vpack.c.bf16 %v1210_v55, %v1209_v26 }
 0xcc8   :  { %2623 = vmatprep.subr.bf16.mxu1 %v2622_v28 }
 0xcc9   :  { %2625 = vmatpush3.bf16.msra.mxu1 %v2622_v28 }
 0xccc   :  { %2520 = vmatmul.mubr.msk.f32.vlgmr.msra.gmra.mrb[8].mxu1 %vm33_vm0, %v2314_v30 }
 0xccd   :  { %2522 = vmatprep.mubr.msk.f32.mxu1 %vm33_vm0, %v2315_v62 }
 0xcd0   :  { %2523 = vmatmul.mubr.msk.f32.gmra.mrb[10].mxu1 %vm33_vm0, %v2316_v0 }
 0xd9f   :  { %v3234_v25 = vpop.f32.mrb[8].mxu1 }
 0xda0   :  { %1315 = vadd.xlane.f32.xlu1 %v3234_v25  ;;  %v3237_v32 = vpop.f32.mrb[9].mxu1  ;;  %v1322_v11 = vmul.f32 %v3234_v25, %v3234_v25 }
 0xda1   :  { %1313 = vadd.xlane.f32.xlu0 %v3237_v32  ;;  %v1321_v15 = vmul.f32 %v3237_v32, %v3237_v32 }
 0xda3   :  { %v3240_v33 = vpop.f32.mrb[10].mxu1 }
 0xda4   :  { %v1324_v34 = vmul.f32 %v3240_v33, %v3240_v33  ;;  %1319 = vadd.xlane.f32.xlu1 %v3240_v33  ;;  %v3247_v35 = vpop.f32.mrb[11].mxu1 }
 0xda5   :  { %1327 = vadd.xlane.f32.xlu0 %v1322_v11  ;;  %v1323_v40 = vmul.f32 %v3247_v35, %v3247_v35 }
 0xda8   :  { %1331 = vadd.xlane.f32.xlu1 %v1324_v34 }
 0xda9   :  { %1325 = vadd.xlane.f32.xlu0 %v1321_v15 }
 0xdad   :  { %1317 = vadd.xlane.f32.xlu0 %v3247_v35 }
 0xdb1   :  { %1329 = vadd.xlane.f32.xlu0 %v1323_v40 }
 0xe2d   :  { %v1316_v13 = vpop.xlane.xlu1 %1315 }
 0xe2e   :  { %v1314_v39 = vpop.xlane.xlu0 %1313  ;;  %v1334_v41 = vmul.f32 0.0625, %v1316_v13 }
 0xe2f   :  { %v1333_v47 = vmul.f32 0.0625, %v1314_v39 }
 0xe30   :  { %v1342_v46 = vmul.f32 %v1334_v41, %v1334_v41 }
 0xe31   :  { %v1320_v2 = vpop.xlane.xlu1 %1319  ;;  %v1341_v22 = vmul.f32 %v1333_v47, %v1333_v47 }
 0xe32   :  { %v1328_v42 = vpop.xlane.xlu0 %1327  ;;  %v1336_v50 = vmul.f32 0.0625, %v1320_v2  ;;  %v2325_v2 = vld [vmem:[%s3531_s1 + $0xc0] sm:$0xff] }
 0xe33   :  { %v1338_v49 = vmul.f32 0.0625, %v1328_v42  ;;  %2533 = vmatprep.mubr.msk.f32.mxu0 %vm33_vm0, %v2325_v2 }
 0xe34   :  { %v1344_v31 = vmul.f32 %v1336_v50, %v1336_v50 }
 0xe35   :  { %v1346_v6 = vsub.f32 %v1338_v49, %v1342_v46  ;;  %v1332_v51 = vpop.xlane.xlu1 %1331 }
 0xe36   :  { %v1326_v3 = vpop.xlane.xlu0 %1325  ;;  %v1340_v60 = vmul.f32 0.0625, %v1332_v51 }
 0xe37   :  { %v1355_v58 = vadd.f32 1e-05, %v1346_v6  ;;  %v1337_v27 = vmul.f32 0.0625, %v1326_v3 }
 0xe38   :  { %v1348_v36 = vsub.f32 %v1340_v60, %v1344_v31 }
 0xe39   :  { %2740 = vrsqrt.f32 %v1355_v58  ;;  %v1345_v29 = vsub.f32 %v1337_v27, %v1341_v22 }
 0xe3a   :  { %v1318_v10 = vpop.xlane.xlu0 %1317  ;;  %v1357_v5 = vadd.f32 1e-05, %v1348_v36 }
 0xe3b   :  { %v1354_v61 = vadd.f32 1e-05, %v1345_v29  ;;  %v1335_v1 = vmul.f32 0.0625, %v1318_v10 }
 0xe3d   :  { %2742 = vrsqrt.f32 %v1354_v61  ;;  %v1343_v38 = vmul.f32 %v1335_v1, %v1335_v1 }
 0xe3e   :  { %v1330_v37 = vpop.xlane.xlu0 %1329  ;;  %2744 = vrsqrt.f32 %v1357_v5 }
 0xe3f   :  { %v1339_v4 = vmul.f32 0.0625, %v1330_v37 }
 0xe41   :  { %v1347_v7 = vsub.f32 %v1339_v4, %v1343_v38 }
 0xe43   :  { %v2741_v9 = vpop.eup %2740  ;;  %v1356_v43 = vadd.f32 1e-05, %v1347_v7 }
 0xe44   :  { %v1363_v12 = vmul.f32 %v2741_v9, %v2322_v8  ;;  %v2327_v9 = vld [vmem:[%s3531_s1 + $0xd0] sm:$0xff] }
 0xe45   :  { %2746 = vrsqrt.f32 %v1356_v43 }
 0xe46   :  { %v1367_v52 = vmul.f32 %v1363_v12, %v1334_v41 }
 0xe47   :  { %v2743_v19 = vpop.eup %2742 }
 0xe48   :  { %1376 = vrot.lane.b32.xlu1 %v1367_v52, %s2773_s12  ;;  %v1362_v20 = vmul.f32 %v2743_v19, %v2321_v14  ;;  %v2745_v48 = vpop.eup %2744 }
 0xe49   :  { %v1365_v30 = vmul.f32 %v2745_v48, %v2324_v57 }
 0xe4a   :  { %v1366_v54 = vmul.f32 %v1362_v20, %v1333_v47 }
 0xe4b   :  { %v1369_v62 = vmul.f32 %v1365_v30, %v1336_v50 }
 0xe4c   :  { %1374 = vrot.lane.b32.xlu0 %v1366_v54, %s2773_s12 }
 0xe4f   :  { %v2747_v56 = vpop.eup %2746 }
 0xe50   :  { %1392 = vperm.xlu0 %2682, %v1362_v20   ;;  %v1364_v21 = vmul.f32 %v2747_v56, %v2323_v23 }
 0xe52   :  { %v1368_v28 = vmul.f32 %v1364_v21, %v1335_v1 }
 0xe54   :  { %1378 = vrot.lane.b32.xlu1 %v1368_v28, %s2773_s12  ;;  %2684 = vset.pattern.permute.xlu0 %v2774_v63 }
 0xe58   :  { %1380 = vrot.lane.b32.xlu1 %v1369_v62, %s2773_s12 }
 0xe5c   :  { %1397 = vperm.xlu1 %2683, %v1363_v12  }
 0xe60   :  { %1402 = vperm.xlu1 %2683, %v1364_v21  }
 0xe64   :  { %1407 = vperm.xlu1 %2683, %v1365_v30  }
 0xe68   :  { %2685 = vset.pattern.permute.xlu1 %v2774_v63 }
 0xeba   :  { %v1377_v0 = vpop.permute.xlu1 %1376 }
 0xebb   :  { %v1387_v11 = vsub.f32 %v2322_v8, %v1377_v0 }
 0xebd   :  { %1421 = vperm.xlu0 %2684, %v1387_v11  }
 0xebe   :  { %v1375_v34 = vpop.permute.xlu0 %1374 }
 0xebf   :  { %v1386_v15 = vsub.f32 %v2321_v14, %v1375_v34 }
 0xec1   :  { %1416 = vperm.xlu1 %2685, %v1386_v15  }
 0xec6   :  { %v1379_v40 = vpop.permute.xlu1 %1378 }
 0xec7   :  { %v1388_v13 = vsub.f32 %v2323_v23, %v1379_v40 }
 0xec9   :  { %1426 = vperm.xlu0 %2684, %v1388_v13  }
 0xeca   :  { %v1381_v39 = vpop.permute.xlu1 %1380 }
 0xecb   :  { %v1389_v41 = vsub.f32 %v2324_v57, %v1381_v39 }
 0xecd   :  { %1431 = vperm.xlu1 %2685, %v1389_v41   ;;  %2686 = vset.pattern.permute.xlu0 %v2772_v18 }
 0xecf   :  { %v1393_v47 = vpop.permute.xlu0 %1392 }
 0xed0   :  { %v1410_v3 = vmul.f32 %v1393_v47, %v3237_v32 }
 0xed1   :  { %2687 = vset.pattern.permute.xlu1 %v2772_v18 }
 0xedb   :  { %v1398_v42 = vpop.permute.xlu1 %1397 }
 0xedc   :  { %v1411_v49 = vmul.f32 %v3234_v25, %v1398_v42 }
 0xedf   :  { %v1403_v46 = vpop.permute.xlu1 %1402 }
 0xee0   :  { %v1412_v10 = vmul.f32 %v1403_v46, %v3247_v35  ;;  %v2326_v35 = vld [vmem:[%s3531_s1 + $0xc8] sm:$0xff] }
 0xee3   :  { %v1408_v50 = vpop.permute.xlu1 %1407 }
 0xee4   :  { %v1413_v25 = vmul.f32 %v3240_v33, %v1408_v50  ;;  %v2328_v33 = vld [vmem:[%s3531_s1 + $0xd8] sm:$0xff] }
 0xf3c   :  { %v1422_v6 = vpop.permute.xlu0 %1421 }
 0xf3d   :  { %v1435_v51 = vadd.f32 %v1422_v6, %v1411_v49 }
 0xf3f   :  { %v1439_v58 = vmul.f32 %v2881_v24, %v1435_v51 }
 0xf40   :  { %v1417_v22 = vpop.permute.xlu1 %1416 }
 0xf41   :  { %v1434_v27 = vadd.f32 %v1417_v22, %v1410_v3  ;;  %v1443_v60 = vmax.f32 %v1439_v58, 0.0 }
 0xf43   :  { %v1438_v31 = vmul.f32 %v2881_v24, %v1434_v27 }
 0xf45   :  { %v1442_v29 = vmax.f32 %v1438_v31, 0.0  ;;  %v2334_v31 = vld [vmem:[%s3532_s2 + $0xc8] sm:$0xff] }
 0xf47   :  { %v2626_v61 = vpack.c.bf16 %v1443_v60, %v1442_v29 }
 0xf48   :  { %v1427_v1 = vpop.permute.xlu0 %1426 }
 0xf49   :  { %v1436_v36 = vadd.f32 %v1427_v1, %v1412_v10  ;;  %2627 = vmatprep.subr.bf16.mxu0 %v2626_v61 }
 0xf4a   :  { %2629 = vmatpush3.bf16.msra.mxu0 %v2626_v61  ;;  %v2333_v61 = vld [vmem:[%s3532_s2 + $0xc0] sm:$0xff] }
 0xf4b   :  { %v1440_v32 = vmul.f32 %v2881_v24, %v1436_v36 }
 0xf4c   :  { %v1432_v37 = vpop.permute.xlu1 %1431 }
 0xf4d   :  { %v1437_v38 = vadd.f32 %v1432_v37, %v1413_v25  ;;  %v1444_v5 = vmax.f32 %v1440_v32, 0.0  ;;  %v2335_v32 = vld [vmem:[%s3532_s2 + $0xd0] sm:$0xff] }
 0xf4f   :  { %v1441_v4 = vmul.f32 %v2881_v24, %v1437_v38 }
 0xf51   :  { %v1445_v7 = vmax.f32 %v1441_v4, 0.0 }
 0xf53   :  { %v2630_v8 = vpack.c.bf16 %v1445_v7, %v1444_v5  ;;  %v2336_v5 = vld [vmem:[%s3532_s2 + $0xd8] sm:$0xff] }
 0xf55   :  { %2631 = vmatprep.subr.bf16.mxu0 %v2630_v8 }
 0xf56   :  { %2633 = vmatpush3.bf16.msra.mxu0 %v2630_v8 }
 0xf59   :  { %2534 = vmatmul.mubr.msk.f32.vlgmr.msra.gmra.mrb[12].mxu0 %vm33_vm0, %v2326_v35 }
 0xf5a   :  { %2536 = vmatprep.mubr.msk.f32.mxu0 %vm33_vm0, %v2327_v9 }
 0xf5d   :  { %2537 = vmatmul.mubr.msk.f32.gmra.mrb[14].mxu0 %vm33_vm0, %v2328_v33 }
0x102c   :  { %v3298_v43 = vpop.f32.mrb[12].mxu0 }
0x102d   :  { %1550 = vadd.xlane.f32.xlu1 %v3298_v43  ;;  %v3301_v12 = vpop.f32.mrb[13].mxu0  ;;  %v1557_v14 = vmul.f32 %v3298_v43, %v3298_v43 }
0x102e   :  { %1548 = vadd.xlane.f32.xlu0 %v3301_v12  ;;  %v1556_v54 = vmul.f32 %v3301_v12, %v3301_v12 }
0x1030   :  { %v3306_v52 = vpop.f32.mrb[14].mxu0 }
0x1031   :  { %v1559_v19 = vmul.f32 %v3306_v52, %v3306_v52  ;;  %1554 = vadd.xlane.f32.xlu1 %v3306_v52  ;;  %v3311_v20 = vpop.f32.mrb[15].mxu0 }
0x1032   :  { %1562 = vadd.xlane.f32.xlu0 %v1557_v14  ;;  %v1558_v23 = vmul.f32 %v3311_v20, %v3311_v20 }
0x1035   :  { %1566 = vadd.xlane.f32.xlu1 %v1559_v19 }
0x1036   :  { %1560 = vadd.xlane.f32.xlu0 %v1556_v54 }
0x103a   :  { %1552 = vadd.xlane.f32.xlu0 %v3311_v20 }
0x103e   :  { %1564 = vadd.xlane.f32.xlu0 %v1558_v23 }
0x10ba   :  { %v1551_v48 = vpop.xlane.xlu1 %1550 }
0x10bb   :  { %v1549_v56 = vpop.xlane.xlu0 %1548  ;;  %v1569_v57 = vmul.f32 0.0625, %v1551_v48 }
0x10bc   :  { %v1568_v62 = vmul.f32 0.0625, %v1549_v56 }
0x10bd   :  { %v1577_v30 = vmul.f32 %v1569_v57, %v1569_v57 }
0x10be   :  { %v1555_v21 = vpop.xlane.xlu1 %1554  ;;  %v1576_v13 = vmul.f32 %v1568_v62, %v1568_v62 }
0x10bf   :  { %v1563_v28 = vpop.xlane.xlu0 %1562  ;;  %v1571_v11 = vmul.f32 0.0625, %v1555_v21  ;;  %v2337_v21 = vld [vmem:[%s3531_s1 + $0xe0] sm:$0xff] }
0x10c0   :  { %v1573_v0 = vmul.f32 0.0625, %v1563_v28  ;;  %2547 = vmatprep.mubr.msk.f32.mxu1 %vm33_vm0, %v2337_v21 }
0x10c1   :  { %v1579_v2 = vmul.f32 %v1571_v11, %v1571_v11 }
0x10c2   :  { %v1581_v34 = vsub.f32 %v1573_v0, %v1577_v30  ;;  %v1567_v15 = vpop.xlane.xlu1 %1566 }
0x10c3   :  { %v1561_v40 = vpop.xlane.xlu0 %1560  ;;  %v1575_v42 = vmul.f32 0.0625, %v1567_v15 }
0x10c4   :  { %v1590_v39 = vadd.f32 1e-05, %v1581_v34  ;;  %v1572_v41 = vmul.f32 0.0625, %v1561_v40 }
0x10c5   :  { %v1583_v6 = vsub.f32 %v1575_v42, %v1579_v2 }
0x10c6   :  { %2748 = vrsqrt.f32 %v1590_v39  ;;  %v1580_v46 = vsub.f32 %v1572_v41, %v1576_v13 }
0x10c7   :  { %v1553_v47 = vpop.xlane.xlu0 %1552  ;;  %v1592_v58 = vadd.f32 1e-05, %v1583_v6 }
0x10c8   :  { %v1589_v49 = vadd.f32 1e-05, %v1580_v46  ;;  %v1570_v50 = vmul.f32 0.0625, %v1553_v47 }
0x10ca   :  { %2750 = vrsqrt.f32 %v1589_v49  ;;  %v1578_v3 = vmul.f32 %v1570_v50, %v1570_v50 }
0x10cb   :  { %v1565_v51 = vpop.xlane.xlu0 %1564  ;;  %2752 = vrsqrt.f32 %v1592_v58 }
0x10cc   :  { %v1574_v22 = vmul.f32 0.0625, %v1565_v51 }
0x10ce   :  { %v1582_v27 = vsub.f32 %v1574_v22, %v1578_v3 }
0x10d0   :  { %v2749_v60 = vpop.eup %2748  ;;  %v1591_v29 = vadd.f32 1e-05, %v1582_v27 }
0x10d1   :  { %v1598_v10 = vmul.f32 %v2749_v60, %v2334_v31 }
0x10d2   :  { %2754 = vrsqrt.f32 %v1591_v29 }
0x10d3   :  { %v1602_v1 = vmul.f32 %v1598_v10, %v1569_v57 }
0x10d4   :  { %v2751_v36 = vpop.eup %2750 }
0x10d5   :  { %1611 = vrot.lane.b32.xlu1 %v1602_v1, %s2773_s12  ;;  %v1597_v25 = vmul.f32 %v2751_v36, %v2333_v61  ;;  %v2753_v38 = vpop.eup %2752 }
0x10d6   :  { %v1600_v35 = vmul.f32 %v2753_v38, %v2336_v5 }
0x10d7   :  { %v1601_v37 = vmul.f32 %v1597_v25, %v1568_v62 }
0x10d8   :  { %v1604_v9 = vmul.f32 %v1600_v35, %v1571_v11 }
0x10d9   :  { %1609 = vrot.lane.b32.xlu0 %v1601_v37, %s2773_s12 }
0x10dc   :  { %v2755_v4 = vpop.eup %2754 }
0x10dd   :  { %1627 = vperm.xlu0 %2686, %v1597_v25   ;;  %v1599_v7 = vmul.f32 %v2755_v4, %v2335_v32 }
0x10df   :  { %v1603_v8 = vmul.f32 %v1599_v7, %v1570_v50 }
0x10e1   :  { %1613 = vrot.lane.b32.xlu1 %v1603_v8, %s2773_s12  ;;  %2688 = vset.pattern.permute.xlu0 %v2774_v63 }
0x10e5   :  { %1615 = vrot.lane.b32.xlu1 %v1604_v9, %s2773_s12 }
0x10e9   :  { %1632 = vperm.xlu1 %2687, %v1598_v10  }
0x10ed   :  { %1637 = vperm.xlu1 %2687, %v1599_v7  }
0x10f1   :  { %1642 = vperm.xlu1 %2687, %v1600_v35  }
0x10f5   :  { %2689 = vset.pattern.permute.xlu1 %v2774_v63 }
0x1147   :  { %v1612_v33 = vpop.permute.xlu1 %1611 }
0x1148   :  { %v1622_v14 = vsub.f32 %v2334_v31, %v1612_v33 }
0x114a   :  { %1656 = vperm.xlu0 %2688, %v1622_v14  }
0x114b   :  { %v1610_v19 = vpop.permute.xlu0 %1609 }
0x114c   :  { %v1621_v54 = vsub.f32 %v2333_v61, %v1610_v19 }
0x114e   :  { %1651 = vperm.xlu1 %2689, %v1621_v54  }
0x1153   :  { %v1614_v23 = vpop.permute.xlu1 %1613 }
0x1154   :  { %v1623_v48 = vsub.f32 %v2335_v32, %v1614_v23 }
0x1156   :  { %1661 = vperm.xlu0 %2688, %v1623_v48  }
0x1157   :  { %v1616_v56 = vpop.permute.xlu1 %1615 }
0x1158   :  { %v1624_v57 = vsub.f32 %v2336_v5, %v1616_v56 }
0x115a   :  { %1666 = vperm.xlu1 %2689, %v1624_v57   ;;  %2690 = vset.pattern.permute.xlu0 %v2772_v18 }
0x115c   :  { %v1628_v62 = vpop.permute.xlu0 %1627 }
0x115d   :  { %v1645_v40 = vmul.f32 %v1628_v62, %v3301_v12 }
0x115e   :  { %2691 = vset.pattern.permute.xlu1 %v2772_v18 }
0x1168   :  { %v1633_v28 = vpop.permute.xlu1 %1632 }
0x1169   :  { %v1646_v0 = vmul.f32 %v3298_v43, %v1633_v28 }
0x116c   :  { %v1638_v30 = vpop.permute.xlu1 %1637 }
0x116d   :  { %v1647_v43 = vmul.f32 %v1638_v30, %v3311_v20 }
0x1170   :  { %v1643_v11 = vpop.permute.xlu1 %1642 }
0x11c9   :  { %v1657_v34 = vpop.permute.xlu0 %1656 }
0x11ca   :  { %v1670_v15 = vadd.f32 %v1657_v34, %v1646_v0 }
0x11cc   :  { %v1674_v13 = vmul.f32 %v2881_v24, %v1670_v15 }
0x11cd   :  { %v1652_v39 = vpop.permute.xlu1 %1651 }
0x11ce   :  { %v1669_v41 = vadd.f32 %v1652_v39, %v1645_v40  ;;  %v3347_v2 = vadd.f32 %v1674_v13, %v1208_v17  ;;  %v1648_v17 = vmul.f32 %v3306_v52, %v1643_v11  ;;  %v2346_v40 = vld [vmem:[%s3532_s2 + $0xe8] sm:$0xff] }
0x11d0   :  { %v1673_v42 = vmul.f32 %v2881_v24, %v1669_v41  ;;  %v1682_v47 = vmax.f32 %v3347_v2, 0.0 }
0x11d2   :  { %v3352_v46 = vadd.f32 %v1673_v42, %v1207_v53  ;;  %v2345_v42 = vld [vmem:[%s3532_s2 + $0xe0] sm:$0xff] }
0x11d4   :  { %v1681_v12 = vmax.f32 %v3352_v46, 0.0 }
0x11d5   :  { %v1662_v49 = vpop.permute.xlu0 %1661 }
0x11d6   :  { %v1671_v50 = vadd.f32 %v1662_v49, %v1647_v43  ;;  %v2634_v44 = vpack.c.bf16 %v1682_v47, %v1681_v12 }
0x11d8   :  { %v1675_v6 = vmul.f32 %v2881_v24, %v1671_v50  ;;  %2635 = vmatprep.subr.bf16.mxu1 %v2634_v44 }
0x11d9   :  { %v1667_v16 = vpop.permute.xlu1 %1666  ;;  %2637 = vmatpush3.bf16.msra.mxu1 %v2634_v44 }
0x11da   :  { %v1672_v53 = vadd.f32 %v1667_v16, %v1648_v17  ;;  %v3365_v20 = vadd.f32 %v1675_v6, %v1209_v26  ;;  %v2340_v26 = vld [vmem:[%s3531_s1 + $0xf8] sm:$0xff]  ;;  %v2347_v17 = vld [vmem:[%s3532_s2 + $0xf0] sm:$0xff] }
0x11dc   :  { %v1676_v51 = vmul.f32 %v2881_v24, %v1672_v53  ;;  %v1683_v22 = vmax.f32 %v3365_v20, 0.0  ;;  %v2348_v53 = vld [vmem:[%s3532_s2 + $0xf8] sm:$0xff] }
0x11de   :  { %v3370_v3 = vadd.f32 %v1676_v51, %v1210_v55 }
0x11e0   :  { %v1684_v52 = vmax.f32 %v3370_v3, 0.0 }
0x11e2   :  { %v2638_v58 = vpack.c.bf16 %v1684_v52, %v1683_v22 }
0x11e4   :  { %2639 = vmatprep.subr.bf16.mxu1 %v2638_v58 }
0x11e5   :  { %2641 = vmatpush3.bf16.msra.mxu1 %v2638_v58 }
0x11e8   :  { %2548 = vmatmul.mubr.msk.f32.vlgmr.msra.gmra.mrb[12].mxu1 %vm33_vm0, %v2338_v59 }
0x11e9   :  { %2550 = vmatprep.mubr.msk.f32.mxu1 %vm33_vm0, %v2339_v45 }
0x11ec   :  { %2551 = vmatmul.mubr.msk.f32.gmra.mrb[14].mxu1 %vm33_vm0, %v2340_v26 }
0x12bb   :  { %v3390_v55 = vpop.f32.mrb[12].mxu1 }
0x12bc   :  { %1789 = vadd.xlane.f32.xlu1 %v3390_v55  ;;  %v3393_v27 = vpop.f32.mrb[13].mxu1  ;;  %v1796_v31 = vmul.f32 %v3390_v55, %v3390_v55 }
0x12bd   :  { %1787 = vadd.xlane.f32.xlu0 %v3393_v27  ;;  %v1795_v61 = vmul.f32 %v3393_v27, %v3393_v27 }
0x12bf   :  { %v3398_v60 = vpop.f32.mrb[14].mxu1 }
0x12c0   :  { %v1798_v29 = vmul.f32 %v3398_v60, %v3398_v60  ;;  %1793 = vadd.xlane.f32.xlu1 %v3398_v60  ;;  %v3403_v10 = vpop.f32.mrb[15].mxu1 }
0x12c1   :  { %1801 = vadd.xlane.f32.xlu0 %v1796_v31  ;;  %v1797_v1 = vmul.f32 %v3403_v10, %v3403_v10 }
0x12c4   :  { %1805 = vadd.xlane.f32.xlu1 %v1798_v29 }
0x12c5   :  { %1799 = vadd.xlane.f32.xlu0 %v1795_v61 }
0x12c9   :  { %1791 = vadd.xlane.f32.xlu0 %v3403_v10 }
0x12cd   :  { %1803 = vadd.xlane.f32.xlu0 %v1797_v1 }
0x1349   :  { %v1790_v36 = vpop.xlane.xlu1 %1789 }
0x134a   :  { %v1788_v25 = vpop.xlane.xlu0 %1787  ;;  %v1808_v37 = vmul.f32 0.0625, %v1790_v36 }
0x134b   :  { %v1807_v5 = vmul.f32 0.0625, %v1788_v25 }
0x134c   :  { %v1816_v4 = vmul.f32 %v1808_v37, %v1808_v37 }
0x134d   :  { %v1794_v32 = vpop.xlane.xlu1 %1793  ;;  %v1815_v14 = vmul.f32 %v1807_v5, %v1807_v5 }
0x134e   :  { %v1802_v38 = vpop.xlane.xlu0 %1801  ;;  %v1810_v8 = vmul.f32 0.0625, %v1794_v32  ;;  %v2349_v32 = vld [vmem:[%s3531_s1 + $0x100] sm:$0xff] }
0x134f   :  { %v1812_v7 = vmul.f32 0.0625, %v1802_v38  ;;  %2561 = vmatprep.mubr.msk.f32.mxu0 %vm33_vm0, %v2349_v32 }
0x1350   :  { %v1818_v23 = vmul.f32 %v1810_v8, %v1810_v8 }
0x1351   :  { %v1820_v35 = vsub.f32 %v1812_v7, %v1816_v4  ;;  %v1806_v9 = vpop.xlane.xlu1 %1805 }
0x1352   :  { %v1800_v33 = vpop.xlane.xlu0 %1799  ;;  %v1814_v48 = vmul.f32 0.0625, %v1806_v9 }
0x1353   :  { %v1829_v19 = vadd.f32 1e-05, %v1820_v35  ;;  %v1811_v54 = vmul.f32 0.0625, %v1800_v33 }
0x1354   :  { %v1822_v30 = vsub.f32 %v1814_v48, %v1818_v23 }
0x1355   :  { %2756 = vrsqrt.f32 %v1829_v19  ;;  %v1819_v56 = vsub.f32 %v1811_v54, %v1815_v14 }
0x1356   :  { %v1792_v57 = vpop.xlane.xlu0 %1791  ;;  %v1831_v34 = vadd.f32 1e-05, %v1822_v30 }
0x1357   :  { %v1828_v21 = vadd.f32 1e-05, %v1819_v56  ;;  %v1809_v28 = vmul.f32 0.0625, %v1792_v57 }
0x1359   :  { %2758 = vrsqrt.f32 %v1828_v21  ;;  %v1817_v0 = vmul.f32 %v1809_v28, %v1809_v28 }
0x135a   :  { %v1804_v62 = vpop.xlane.xlu0 %1803  ;;  %2760 = vrsqrt.f32 %v1831_v34 }
0x135b   :  { %v1813_v11 = vmul.f32 0.0625, %v1804_v62 }
0x135d   :  { %v1821_v15 = vsub.f32 %v1813_v11, %v1817_v0 }
0x135f   :  { %v2757_v13 = vpop.eup %2756  ;;  %v1830_v39 = vadd.f32 1e-05, %v1821_v15 }
0x1360   :  { %v1837_v41 = vmul.f32 %v2757_v13, %v2346_v40  ;;  %v2351_v13 = vld [vmem:[%s3531_s1 + $0x110] sm:$0xff] }
0x1361   :  { %2762 = vrsqrt.f32 %v1830_v39 }
0x1362   :  { %v1841_v43 = vmul.f32 %v1837_v41, %v1808_v37 }
0x1363   :  { %v2759_v49 = vpop.eup %2758 }
0x1364   :  { %1850 = vrot.lane.b32.xlu1 %v1841_v43, %s2773_s12  ;;  %v1836_v50 = vmul.f32 %v2759_v49, %v2345_v42  ;;  %v2761_v6 = vpop.eup %2760 }
0x1365   :  { %v1839_v59 = vmul.f32 %v2761_v6, %v2348_v53 }
0x1366   :  { %v1840_v44 = vmul.f32 %v1836_v50, %v1807_v5 }
0x1367   :  { %v1843_v45 = vmul.f32 %v1839_v59, %v1810_v8 }
0x1368   :  { %1848 = vrot.lane.b32.xlu0 %v1840_v44, %s2773_s12 }
0x136b   :  { %v2763_v16 = vpop.eup %2762 }
0x136c   :  { %1866 = vperm.xlu0 %2690, %v1836_v50   ;;  %v1838_v51 = vmul.f32 %v2763_v16, %v2347_v17 }
0x136e   :  { %v1842_v58 = vmul.f32 %v1838_v51, %v1809_v28 }
0x1370   :  { %1852 = vrot.lane.b32.xlu1 %v1842_v58, %s2773_s12  ;;  %2692 = vset.pattern.permute.xlu0 %v2774_v63 }
0x1374   :  { %1854 = vrot.lane.b32.xlu1 %v1843_v45, %s2773_s12 }
0x1378   :  { %1871 = vperm.xlu1 %2691, %v1837_v41  }
0x137c   :  { %1876 = vperm.xlu1 %2691, %v1838_v51  }
0x1380   :  { %1881 = vperm.xlu1 %2691, %v1839_v59  }
0x1384   :  { %2693 = vset.pattern.permute.xlu1 %v2774_v63 }
0x13d6   :  { %v1851_v26 = vpop.permute.xlu1 %1850 }
0x13d7   :  { %v1861_v31 = vsub.f32 %v2346_v40, %v1851_v26 }
0x13d9   :  { %1895 = vperm.xlu0 %2692, %v1861_v31  }
0x13da   :  { %v1849_v29 = vpop.permute.xlu0 %1848 }
0x13db   :  { %v1860_v61 = vsub.f32 %v2345_v42, %v1849_v29 }
0x13dd   :  { %1890 = vperm.xlu1 %2693, %v1860_v61  }
0x13e2   :  { %v1853_v1 = vpop.permute.xlu1 %1852 }
0x13e3   :  { %v1862_v36 = vsub.f32 %v2347_v17, %v1853_v1 }
0x13e5   :  { %1900 = vperm.xlu0 %2692, %v1862_v36  }
0x13e6   :  { %v1855_v25 = vpop.permute.xlu1 %1854 }
0x13e7   :  { %v1863_v37 = vsub.f32 %v2348_v53, %v1855_v25 }
0x13e9   :  { %1905 = vperm.xlu1 %2693, %v1863_v37   ;;  %2694 = vset.pattern.permute.xlu0 %v2772_v18 }
0x13eb   :  { %v1867_v5 = vpop.permute.xlu0 %1866 }
0x13ec   :  { %v1884_v33 = vmul.f32 %v1867_v5, %v3393_v27 }
0x13ed   :  { %2695 = vset.pattern.permute.xlu1 %v2772_v18 }
0x13f7   :  { %v1872_v38 = vpop.permute.xlu1 %1871 }
0x13f8   :  { %v1885_v7 = vmul.f32 %v3390_v55, %v1872_v38 }
0x13fb   :  { %v1877_v4 = vpop.permute.xlu1 %1876 }
0x13fc   :  { %v1886_v57 = vmul.f32 %v1877_v4, %v3403_v10  ;;  %v2350_v10 = vld [vmem:[%s3531_s1 + $0x108] sm:$0xff] }
0x13ff   :  { %v1882_v8 = vpop.permute.xlu1 %1881 }
0x1400   :  { %v1887_v55 = vmul.f32 %v3398_v60, %v1882_v8  ;;  %v2352_v60 = vld [vmem:[%s3531_s1 + $0x118] sm:$0xff] }
0x1458   :  { %v1896_v35 = vpop.permute.xlu0 %1895 }
0x1459   :  { %v1909_v9 = vadd.f32 %v1896_v35, %v1885_v7 }
0x145b   :  { %v1913_v19 = vmul.f32 %v2881_v24, %v1909_v9 }
0x145c   :  { %v1891_v14 = vpop.permute.xlu1 %1890 }
0x145d   :  { %v1908_v54 = vadd.f32 %v1891_v14, %v1884_v33  ;;  %v1917_v48 = vmax.f32 %v1913_v19, 0.0 }
0x145f   :  { %v1912_v23 = vmul.f32 %v2881_v24, %v1908_v54 }
0x1461   :  { %v1916_v56 = vmax.f32 %v1912_v23, 0.0  ;;  %v2358_v23 = vld [vmem:[%s3532_s2 + $0x108] sm:$0xff] }
0x1463   :  { %v2642_v21 = vpack.c.bf16 %v1917_v48, %v1916_v56 }
0x1464   :  { %v1901_v28 = vpop.permute.xlu0 %1900 }
0x1465   :  { %v1910_v30 = vadd.f32 %v1901_v28, %v1886_v57  ;;  %2643 = vmatprep.subr.bf16.mxu0 %v2642_v21 }
0x1466   :  { %2645 = vmatpush3.bf16.msra.mxu0 %v2642_v21  ;;  %v2357_v21 = vld [vmem:[%s3532_s2 + $0x100] sm:$0xff] }
0x1467   :  { %v1914_v27 = vmul.f32 %v2881_v24, %v1910_v30 }
0x1468   :  { %v1906_v62 = vpop.permute.xlu1 %1905 }
0x1469   :  { %v1911_v0 = vadd.f32 %v1906_v62, %v1887_v55  ;;  %v1918_v34 = vmax.f32 %v1914_v27, 0.0  ;;  %v2359_v27 = vld [vmem:[%s3532_s2 + $0x110] sm:$0xff] }
0x146b   :  { %v1915_v11 = vmul.f32 %v2881_v24, %v1911_v0 }
0x146d   :  { %v1919_v15 = vmax.f32 %v1915_v11, 0.0 }
0x146f   :  { %v2646_v40 = vpack.c.bf16 %v1919_v15, %v1918_v34  ;;  %v2360_v34 = vld [vmem:[%s3532_s2 + $0x118] sm:$0xff] }
0x1471   :  { %2647 = vmatprep.subr.bf16.mxu0 %v2646_v40 }
0x1472   :  { %2649 = vmatpush3.bf16.msra.mxu0 %v2646_v40 }
0x1475   :  { %2562 = vmatmul.mubr.msk.f32.vlgmr.msra.gmra.mrb[16].mxu0 %vm33_vm0, %v2350_v10 }
0x1476   :  { %2564 = vmatprep.mubr.msk.f32.mxu0 %vm33_vm0, %v2351_v13 }
0x1479   :  { %2565 = vmatmul.mubr.msk.f32.gmra.mrb[18].mxu0 %vm33_vm0, %v2352_v60 }
0x1548   :  { %v3454_v39 = vpop.f32.mrb[16].mxu0 }
0x1549   :  { %2024 = vadd.xlane.f32.xlu1 %v3454_v39  ;;  %v3457_v41 = vpop.f32.mrb[17].mxu0  ;;  %v2031_v42 = vmul.f32 %v3454_v39, %v3454_v39 }
0x154a   :  { %2022 = vadd.xlane.f32.xlu0 %v3457_v41  ;;  %v2030_v44 = vmul.f32 %v3457_v41, %v3457_v41 }
0x154c   :  { %v3462_v43 = vpop.f32.mrb[18].mxu0 }
0x154d   :  { %v2033_v49 = vmul.f32 %v3462_v43, %v3462_v43  ;;  %2028 = vadd.xlane.f32.xlu1 %v3462_v43  ;;  %v3467_v50 = vpop.f32.mrb[19].mxu0 }
0x154e   :  { %2036 = vadd.xlane.f32.xlu0 %v2031_v42  ;;  %v2032_v17 = vmul.f32 %v3467_v50, %v3467_v50 }
0x1551   :  { %2040 = vadd.xlane.f32.xlu1 %v2033_v49 }
0x1552   :  { %2034 = vadd.xlane.f32.xlu0 %v2030_v44 }
0x1556   :  { %2026 = vadd.xlane.f32.xlu0 %v3467_v50 }
0x155a   :  { %2038 = vadd.xlane.f32.xlu0 %v2032_v17 }
0x15d6   :  { %v2025_v6 = vpop.xlane.xlu1 %2024 }
0x15d7   :  { %v2023_v16 = vpop.xlane.xlu0 %2022  ;;  %v2043_v53 = vmul.f32 0.0625, %v2025_v6 }
0x15d8   :  { %v2042_v45 = vmul.f32 0.0625, %v2023_v16 }
0x15d9   :  { %v2051_v59 = vmul.f32 %v2043_v53, %v2043_v53 }
0x15da   :  { %v2029_v51 = vpop.xlane.xlu1 %2028  ;;  %v2050_v36 = vmul.f32 %v2042_v45, %v2042_v45 }
0x15db   :  { %v2037_v58 = vpop.xlane.xlu0 %2036  ;;  %v2045_v31 = vmul.f32 0.0625, %v2029_v51  ;;  %v2161_v51 = vld [vmem:[%s3534_s4] sm:$0xff] }
0x15dc   :  { %v2047_v26 = vmul.f32 0.0625, %v2037_v58  ;;  %v2162_v58 = vld [vmem:[%s3534_s4 + $0x8] sm:$0xff] }
0x15dd   :  { %v2053_v32 = vmul.f32 %v2045_v31, %v2045_v31 }
0x15de   :  { %v2055_v29 = vsub.f32 %v2047_v26, %v2051_v59  ;;  %v2041_v61 = vpop.xlane.xlu1 %2040 }
0x15df   :  { %v2035_v1 = vpop.xlane.xlu0 %2034  ;;  %v2049_v38 = vmul.f32 0.0625, %v2041_v61 }
0x15e0   :  { %v2064_v25 = vadd.f32 1e-05, %v2055_v29  ;;  %v2046_v37 = vmul.f32 0.0625, %v2035_v1 }
0x15e1   :  { %v2057_v35 = vsub.f32 %v2049_v38, %v2053_v32 }
0x15e2   :  { %2764 = vrsqrt.f32 %v2064_v25  ;;  %v2054_v4 = vsub.f32 %v2046_v37, %v2050_v36 }
0x15e3   :  { %v2027_v5 = vpop.xlane.xlu0 %2026  ;;  %v2066_v19 = vadd.f32 1e-05, %v2057_v35 }
0x15e4   :  { %v2063_v7 = vadd.f32 1e-05, %v2054_v4  ;;  %v2044_v8 = vmul.f32 0.0625, %v2027_v5 }
0x15e6   :  { %2766 = vrsqrt.f32 %v2063_v7  ;;  %v2052_v33 = vmul.f32 %v2044_v8, %v2044_v8 }
0x15e7   :  { %v2039_v9 = vpop.xlane.xlu0 %2038  ;;  %2768 = vrsqrt.f32 %v2066_v19 }
0x15e8   :  { %v2048_v14 = vmul.f32 0.0625, %v2039_v9 }
0x15ea   :  { %v2056_v54 = vsub.f32 %v2048_v14, %v2052_v33 }
0x15ec   :  { %v2765_v48 = vpop.eup %2764  ;;  %v2065_v56 = vadd.f32 1e-05, %v2056_v54 }
0x15ed   :  { %v2072_v57 = vmul.f32 %v2765_v48, %v2358_v23 }
0x15ee   :  { %2770 = vrsqrt.f32 %v2065_v56 }
0x15ef   :  { %v2076_v28 = vmul.f32 %v2072_v57, %v2043_v53 }
0x15f0   :  { %v2767_v30 = vpop.eup %2766 }
0x15f1   :  { %2085 = vrot.lane.b32.xlu1 %v2076_v28, %s2773_s12  ;;  %v2071_v55 = vmul.f32 %v2767_v30, %v2357_v21  ;;  %v2769_v0 = vpop.eup %2768 }
0x15f2   :  { %v2074_v10 = vmul.f32 %v2769_v0, %v2360_v34 }
0x15f3   :  { %v2075_v62 = vmul.f32 %v2071_v55, %v2042_v45 }
0x15f4   :  { %v2078_v13 = vmul.f32 %v2074_v10, %v2045_v31 }
0x15f5   :  { %2083 = vrot.lane.b32.xlu0 %v2075_v62, %s2773_s12 }
0x15f8   :  { %v2771_v11 = vpop.eup %2770 }
0x15f9   :  { %2101 = vperm.xlu0 %2694, %v2071_v55   ;;  %v2073_v15 = vmul.f32 %v2771_v11, %v2359_v27 }
0x15fb   :  { %v2077_v40 = vmul.f32 %v2073_v15, %v2044_v8 }
0x15fd   :  { %2087 = vrot.lane.b32.xlu1 %v2077_v40, %s2773_s12  ;;  %2696 = vset.pattern.permute.xlu0 %v2774_v63 }
0x1601   :  { %2089 = vrot.lane.b32.xlu1 %v2078_v13, %s2773_s12 }
0x1605   :  { %2106 = vperm.xlu1 %2695, %v2072_v57  }
0x1609   :  { %2111 = vperm.xlu1 %2695, %v2073_v15  }
0x160d   :  { %2116 = vperm.xlu1 %2695, %v2074_v10  }
0x1611   :  { %2697 = vset.pattern.permute.xlu1 %v2774_v63  ;;  %v2159_v63 = vld [vmem:[%s3533_s3] sm:$0xff] }
0x1612   :  { %2575 = vmatprep.mubr.msk.f32.mxu1 %vm33_vm0, %v2159_v63 }
0x1663   :  { %v2086_v60 = vpop.permute.xlu1 %2085 }
0x1664   :  { %v2096_v42 = vsub.f32 %v2358_v23, %v2086_v60 }
0x1666   :  { %2130 = vperm.xlu0 %2696, %v2096_v42  }
0x1667   :  { %v2084_v49 = vpop.permute.xlu0 %2083 }
0x1668   :  { %v2095_v44 = vsub.f32 %v2357_v21, %v2084_v49 }
0x166a   :  { %2125 = vperm.xlu1 %2697, %v2095_v44  }
0x166f   :  { %v2088_v17 = vpop.permute.xlu1 %2087 }
0x1670   :  { %v2097_v6 = vsub.f32 %v2359_v27, %v2088_v17 }
0x1672   :  { %2135 = vperm.xlu0 %2696, %v2097_v6  }
0x1673   :  { %v2090_v16 = vpop.permute.xlu1 %2089 }
0x1674   :  { %v2098_v53 = vsub.f32 %v2360_v34, %v2090_v16 }
0x1676   :  { %2140 = vperm.xlu1 %2697, %v2098_v53   ;;  %2698 = vset.pattern.permute.xlu0 %v2772_v18 }
0x1677   :  { %2165 = vperm.xlu0 %2698, %v2161_v51  }
0x1678   :  { %v2102_v26 = vpop.permute.xlu0 %2101 }
0x1679   :  { %v2119_v1 = vmul.f32 %v2102_v26, %v3457_v41 }
0x167a   :  { %2699 = vset.pattern.permute.xlu1 %v2772_v18 }
0x167b   :  { %2170 = vperm.xlu1 %2699, %v2162_v58  }
0x1684   :  { %v2107_v59 = vpop.permute.xlu1 %2106 }
0x1685   :  { %v2120_v18 = vmul.f32 %v3454_v39, %v2107_v59 }
0x1688   :  { %v2112_v45 = vpop.permute.xlu1 %2111 }
0x1689   :  { %v2121_v5 = vmul.f32 %v2112_v45, %v3467_v50 }
0x168c   :  { %v2117_v31 = vpop.permute.xlu1 %2116 }
0x168d   :  { %v2122_v41 = vmul.f32 %v3462_v43, %v2117_v31  ;;  %v2160_v43 = vld [vmem:[%s3533_s3 + $0x8] sm:$0xff] }
0x16e5   :  { %v2131_v29 = vpop.permute.xlu0 %2130 }
0x16e6   :  { %v2144_v61 = vadd.f32 %v2131_v29, %v2120_v18 }
0x16e8   :  { %v2148_v36 = vmul.f32 %v2881_v24, %v2144_v61 }
0x16e9   :  { %v2126_v25 = vpop.permute.xlu1 %2125 }
0x16ea   :  { %v2143_v37 = vadd.f32 %v2126_v25, %v2119_v1  ;;  %v2152_v32 = vadd.f32 %v2148_v36, %v1682_v47 }
0x16ec   :  { %v2147_v38 = vmul.f32 %v2881_v24, %v2143_v37  ;;  %v2156_v39 = vmax.f32 %v2152_v32, 0.0 }
0x16ee   :  { %v2151_v4 = vadd.f32 %v2147_v38, %v1681_v12 }
0x16f0   :  { %v2155_v7 = vmax.f32 %v2151_v4, 0.0 }
0x16f1   :  { %v2136_v8 = vpop.permute.xlu0 %2135 }
0x16f2   :  { %v2145_v35 = vadd.f32 %v2136_v8, %v2121_v5  ;;  %v2650_v9 = vpack.c.bf16 %v2156_v39, %v2155_v7 }
0x16f4   :  { %v2149_v33 = vmul.f32 %v2881_v24, %v2145_v35  ;;  %2651 = vmatprep.subr.bf16.mxu1 %v2650_v9 }
0x16f5   :  { %v2141_v14 = vpop.permute.xlu1 %2140  ;;  %2653 = vmatpush3.bf16.msra.mxu1 %v2650_v9 }
0x16f6   :  { %v2146_v2 = vadd.f32 %v2141_v14, %v2122_v41  ;;  %v2153_v47 = vadd.f32 %v2149_v33, %v1683_v22  ;;  %v2166_v48 = vpop.permute.xlu0 %2165 }
0x16f8   :  { %v2150_v46 = vmul.f32 %v2881_v24, %v2146_v2  ;;  %v2157_v50 = vmax.f32 %v2153_v47, 0.0 }
0x16fa   :  { %v2154_v12 = vadd.f32 %v2150_v46, %v1684_v52  ;;  %v2171_v23 = vpop.permute.xlu1 %2170 }
0x16fc   :  { %v2158_v19 = vmax.f32 %v2154_v12, 0.0 }
0x16fe   :  { %v2654_v54 = vpack.c.bf16 %v2158_v19, %v2157_v50 }
0x1700   :  { %2655 = vmatprep.subr.bf16.mxu1 %v2654_v54 }
0x1701   :  { %2657 = vmatpush3.bf16.msra.mxu1 %v2654_v54 }
0x1704   :  { %2576 = vmatmul.mubr.msk.f32.vlgmr.msra.gmra.mrb[16].mxu1 %vm33_vm0, %v2160_v43 }
0x17d7   :  { %v2577_v20 = vpop.f32.mrb[16].mxu1 }
0x17d8   :  { %v2251_v22 = vadd.f32 %v2577_v20, %v2171_v23  ;;  %v2245_v56 = vpop.f32.mrb[17].mxu1 }
0x17d9   :  { %v2246_v24 = vadd.f32 %v2245_v56, %v2166_v48 }
0x17da   :  { %2255 = vst [vmem:[%s3535_s5 + $0x8] sm:$0xff] %v2251_v22 }
0x17db   :  { %2254 = vst [vmem:[%s3535_s5] sm:$0xff] %v2246_v24 }

</bundles_post_ra>
